<compile_context>
chip_gen: v7x
topology: tpu7x:2x2x1
jax: 0.10.0
libtpu: 0.0.40
codegen_flags: <defaults>
</compile_context>

<pallas_src>
from functools import partial

import jax
import jax.numpy as jnp
from jax.experimental import pallas as pl
from jax.experimental.pallas import tpu as pltpu

LANE = 128


def _prelu(v, a):
    return jnp.maximum(v, 0.0) + a * jnp.minimum(v, 0.0)


def gnp_block_kernel(n_iter,
                     x_ref, aE_ref, aG_ref, sE_ref, sG_ref, sdst_ref, pool_ref,
                     wih_ref, whh_ref, wmisc_ref, ptab_ref, scal_ref,
                     x_out_ref, gemb_ref):
    f32, bf16 = jnp.float32, jnp.bfloat16
    MN, Hp = x_ref.shape[1], x_ref.shape[2]
    ME = aE_ref.shape[1]

    x = x_ref[0]            # (MN, Hp) f32  node state of this graph
    A_e = aE_ref[0]         # (ME, Hp) f32  aline @ edge_attr   (loop-invariant)
    A_g = aG_ref[0]         # (ME, MN) bf16 aline @ gavg
    S_e = sE_ref[0]         # (MN, Hp) f32  sdst  @ edge_attr
    S_g = sG_ref[0]         # (MN, MN) bf16 sdst  @ gavg
    sdst = sdst_ref[0]      # (MN, ME) bf16 scatter-mean onto dst
    pool = pool_ref[0]      # (2, MN)  bf16 row0 = add-pool mask, row1 = mean-pool weights

    wih_t = wih_ref[...]    # (Hp, 3Hp) bf16, GRU gates ordered [r|z|n]
    whh_t = whh_ref[...]    # (Hp, 3Hp) bf16
    we_t = wmisc_ref[:, 0:Hp]            # edge_update_net Linear
    w1_t = wmisc_ref[:, Hp:2 * Hp]       # attention Linear 1
    wr_t = wmisc_ref[:, 2 * Hp:3 * Hp]   # readout Linear

    # ---- bias / folded-BN broadcasts: materialized once, reused by every unrolled iteration ----
    be   = jnp.broadcast_to(ptab_ref[0:1, 0:Hp], (ME, Hp))
    bns  = jnp.broadcast_to(ptab_ref[0:1, Hp:2 * Hp], (ME, Hp))        # eval-BN scale
    bnsh = jnp.broadcast_to(ptab_ref[0:1, 2 * Hp:3 * Hp], (ME, Hp))    # eval-BN shift
    bih  = jnp.broadcast_to(ptab_ref[1:2, :], (MN, 3 * Hp))
    bhh  = jnp.broadcast_to(ptab_ref[2:3, :], (MN, 3 * Hp))
    b1   = ptab_ref[3:4, 0:Hp]
    w2   = ptab_ref[4:5, 0:Hp]
    br   = ptab_ref[5:6, 0:Hp]

    alpha_e = scal_ref[0]   # PReLU slopes / attention bias live in SMEM
    alpha_1 = scal_ref[1]
    b2 = scal_ref[2]

    def iteration(xc):
        xb = xc.astype(bf16)
        # --- EdgeToEdgeMessagePassing (node_to_edge_proj is Identity: node_dim == edge_dim) ---
        agg = A_e + jnp.dot(A_g, xb, preferred_element_type=f32)                  # (ME, Hp)
        eu = jnp.dot(agg.astype(bf16), we_t, preferred_element_type=f32) + be     # Linear
        eu = _prelu(eu, alpha_e)                                                   # PReLU
        eu = eu * bns + bnsh                                                       # folded eval BN
        nu = (S_e + jnp.dot(S_g, xb, preferred_element_type=f32)
              + jnp.dot(sdst, eu.astype(bf16), preferred_element_type=f32))        # (MN, Hp)
        # --- single-step GRU cell, gates fused into two (., 3Hp) matmuls, PyTorch order r,z,n ---
        gi = jnp.dot(nu.astype(bf16), wih_t, preferred_element_type=f32) + bih
        gh = jnp.dot(xb, whh_t, preferred_element_type=f32) + bhh
        r = jax.nn.sigmoid(gi[:, 0:Hp] + gh[:, 0:Hp])
        z = jax.nn.sigmoid(gi[:, Hp:2 * Hp] + gh[:, Hp:2 * Hp])
        ng = jnp.tanh(gi[:, 2 * Hp:3 * Hp] + r * gh[:, 2 * Hp:3 * Hp])
        return (1.0 - z) * ng + z * xc

    if n_iter <= 4:
        for _ in range(n_iter):
            x = iteration(x)
    else:
        # partial unroll: bounds code size / vreg live ranges but keeps LLO scheduling visibility
        x = jax.lax.fori_loop(0, n_iter, lambda _, xc: iteration(xc), x, unroll=2)

    # --- DynamicAttention + global_add_pool + readout, pool folded algebraically ---
    pooled = jnp.dot(pool, x.astype(bf16), preferred_element_type=f32)             # (2, Hp)
    graph_sum = pooled[0:1, :]                                                      # add-pool
    graph_repr = pooled[1:2, :]                                                     # mean-pool
    h1 = _prelu(jnp.dot(graph_repr.astype(bf16), w1_t, preferred_element_type=f32) + b1, alpha_1)
    score = jax.nn.sigmoid(jnp.sum(h1 * w2, axis=-1, keepdims=True) + b2)           # (1, 1)
    gemb = jnp.dot((score * graph_sum).astype(bf16), wr_t, preferred_element_type=f32) + br

    x_out_ref[0] = x
    gemb_ref[0] = gemb


def init_params(key, H, KGE):
    ks = jax.random.split(key, 12)
    s = 0.1
    p = {}
    # edge_update_net: Linear(H,H) -> PReLU -> BatchNorm1d(H)
    p["we"] = s * jax.random.normal(ks[0], (H, H), jnp.float32)
    p["be"] = s * jax.random.normal(ks[1], (H,), jnp.float32)
    p["ae"] = jnp.array(0.25, jnp.float32)          # PReLU default init
    p["bn_gamma"] = jnp.ones((H,), jnp.float32)
    p["bn_beta"] = jnp.zeros((H,), jnp.float32)
    p["bn_mean"] = jnp.zeros((H,), jnp.float32)
    p["bn_var"] = jnp.ones((H,), jnp.float32)
    # GRU(H, H): weight_ih (3H, H) rows ordered [r, z, n]
    p["wih"] = s * jax.random.normal(ks[2], (3 * H, H), jnp.float32)
    p["whh"] = s * jax.random.normal(ks[3], (3 * H, H), jnp.float32)
    p["bih"] = s * jax.random.normal(ks[4], (3 * H,), jnp.float32)
    p["bhh"] = s * jax.random.normal(ks[5], (3 * H,), jnp.float32)
    # attention_net: Linear(H, H//2) -> PReLU -> Linear(H//2, 1) -> Sigmoid
    p["w1"] = s * jax.random.normal(ks[6], (H // 2, H), jnp.float32)
    p["b1"] = s * jax.random.normal(ks[7], (H // 2,), jnp.float32)
    p["a1"] = jnp.array(0.25, jnp.float32)
    p["w2"] = s * jax.random.normal(ks[8], (1, H // 2), jnp.float32)
    p["b2"] = s * jax.random.normal(ks[9], (1,), jnp.float32)
    # readout Linear(H, KGE)
    p["wr"] = s * jax.random.normal(ks[10], (KGE, H), jnp.float32)
    p["br"] = s * jax.random.normal(ks[11], (KGE,), jnp.float32)
    return p


def _pad2(a, rows, cols):
    return jnp.pad(a, ((0, rows - a.shape[0]), (0, cols - a.shape[1])))


def _pad1(v, cols):
    return jnp.pad(v, (0, cols - v.shape[0]))


@partial(jax.jit, static_argnames=("num_graphs", "max_nodes", "max_edges", "n_iter"))
def gnp_block_forward(params, x, edge_index, edge_attr, batch, line_graph_edge_index,
                      num_graphs, max_nodes, max_edges, n_iter=2):
    f32, bf16 = jnp.float32, jnp.bfloat16
    N, H = x.shape
    E = edge_attr.shape[0]
    G = num_graphs
    MN = ((max_nodes + 7) // 8) * 8                      # per-graph node block (sublane aligned)
    ME = ((max_edges + 7) // 8) * 8                      # per-graph edge block
    KGE = params["wr"].shape[0]
    Hh = params["w1"].shape[0]                           # H // 2
    Hp = ((max(H, Hh, KGE) + LANE - 1) // LANE) * LANE   # one lane-dense pad for all feature dims

    # ---------- dense structure (built once in XLA glue) ----------
    # TODO(synk): at production graph sizes replace the dense one-hot scatter/gather matrices
    # with index-driven gathers / segment-adds (PrefetchScalarGridSpec + pl.Element row gathers).
    src, dst = edge_index[0], edge_index[1]
    ebatch = batch[dst]                                  # graph of each edge (no cross-graph edges)
    oh_src = jax.nn.one_hot(src, N, dtype=f32)           # (E, N)
    oh_dst = jax.nn.one_hot(dst, N, dtype=f32)           # (E, N)
    gavg = 0.5 * (oh_src + oh_dst)                       # (proj_src + proj_dst)/2 gather
    sdst = oh_dst.T
    sdst = sdst / jnp.maximum(jnp.sum(sdst, axis=1, keepdims=True), 1.0)     # (N, E) scatter-mean
    lsrc, ldst = line_graph_edge_index[0], line_graph_edge_index[1]
    aline = jnp.dot(jax.nn.one_hot(ldst, E, dtype=f32).T,
                    jax.nn.one_hot(lsrc, E, dtype=f32))                      # (E, E)
    aline = aline / jnp.maximum(jnp.sum(aline, axis=1, keepdims=True), 1.0)  # line-graph scatter-mean

    x_p = _pad2(x, N, Hp)
    ea_p = _pad2(edge_attr, E, Hp)

    # loop-invariant hoists (edge_attr / structure never change across iterations)
    A_e = jnp.dot(aline, ea_p)       # (E, Hp)
    A_g = jnp.dot(aline, gavg)       # (E, N)
    S_e = jnp.dot(sdst, ea_p)        # (N, Hp)
    S_g = jnp.dot(sdst, gavg)        # (N, N)

    # ---------- per-graph blocking (grid axis = graphs; exact since graphs are independent) ----------
    nids = jnp.arange(N)
    nloc = jnp.sum((batch[None, :] == batch[:, None]) & (nids[None, :] < nids[:, None]), axis=1)
    eids = jnp.arange(E)
    eloc = jnp.sum((ebatch[None, :] == ebatch[:, None]) & (eids[None, :] < eids[:, None]), axis=1)
    ngat = jnp.einsum("ng,nm->gmn", jax.nn.one_hot(batch, G, dtype=f32),
                      jax.nn.one_hot(nloc, MN, dtype=f32))                   # (G, MN, N)
    egat = jnp.einsum("eg,ep->gpe", jax.nn.one_hot(ebatch, G, dtype=f32),
                      jax.nn.one_hot(eloc, ME, dtype=f32))                   # (G, ME, E)

    x_blk  = jnp.einsum("gmn,nh->gmh", ngat, x_p)                            # (G, MN, Hp) f32
    Ae_blk = jnp.einsum("gpe,eh->gph", egat, A_e)                            # (G, ME, Hp) f32
    Se_blk = jnp.einsum("gmn,nh->gmh", ngat, S_e)                            # (G, MN, Hp) f32
    Ag_blk = jnp.einsum("gpe,en,gmn->gpm", egat, A_g, ngat).astype(bf16)     # (G, ME, MN)
    Sg_blk = jnp.einsum("gmn,nk,gqk->gmq", ngat, S_g, ngat).astype(bf16)     # (G, MN, MN)
    sd_blk = jnp.einsum("gmn,ne,gpe->gmp", ngat, sdst, egat).astype(bf16)    # (G, MN, ME)

    nmask = jnp.sum(ngat, axis=2)                                            # (G, MN) valid rows
    cnt = jnp.maximum(jnp.sum(nmask, axis=1, keepdims=True), 1.0)
    pool_blk = jnp.stack([nmask, nmask / cnt], axis=1).astype(bf16)          # (G, 2, MN)

    # ---------- weights: pre-transpose, pad lane-dense, fuse GRU gates, cast bf16 ----------
    we_t = _pad2(params["we"].T, Hp, Hp)
    w1_t = _pad2(params["w1"].T, Hp, Hp)
    wr_t = _pad2(params["wr"].T, Hp, Hp)
    wmisc = jnp.concatenate([we_t, w1_t, wr_t], axis=1).astype(bf16)         # (Hp, 3Hp)

    def gate_w(w, i):
        return _pad2(w[i * H:(i + 1) * H].T, Hp, Hp)

    wih_t = jnp.concatenate([gate_w(params["wih"], i) for i in range(3)], axis=1).astype(bf16)
    whh_t = jnp.concatenate([gate_w(params["whh"], i) for i in range(3)], axis=1).astype(bf16)

    # eval-mode BatchNorm folded into per-feature scale/shift
    bn_scale = params["bn_gamma"] * jax.lax.rsqrt(params["bn_var"] + 1e-5)
    bn_shift = params["bn_beta"] - params["bn_mean"] * bn_scale

    def gate_b(b, i):
        return _pad1(b[i * H:(i + 1) * H], Hp)

    zrow = jnp.zeros((3 * Hp,), f32)
    ptab = jnp.stack([
        jnp.concatenate([_pad1(params["be"], Hp), _pad1(bn_scale, Hp), _pad1(bn_shift, Hp)]),
        jnp.concatenate([gate_b(params["bih"], i) for i in range(3)]),
        jnp.concatenate([gate_b(params["bhh"], i) for i in range(3)]),
        _pad1(params["b1"], 3 * Hp),
        _pad1(params["w2"][0], 3 * Hp),
        _pad1(params["br"], 3 * Hp),
        zrow, zrow,
    ])                                                                       # (8, 3Hp) f32

    scal = jnp.stack([params["ae"], params["a1"], params["b2"][0]]).astype(f32)

    # ---------- specs, compiler params, cost estimate ----------
    def per_graph(r, c):
        return pl.BlockSpec((1, r, c), lambda g: (g, 0, 0))

    def resident(r, c):                                  # constant index_map -> stays in VMEM
        return pl.BlockSpec((r, c), lambda g: (0, 0))

    in_specs = [
        per_graph(MN, Hp),   # x_blk   (aliased to x_out)
        per_graph(ME, Hp),   # Ae_blk
        per_graph(ME, MN),   # Ag_blk
        per_graph(MN, Hp),   # Se_blk
        per_graph(MN, MN),   # Sg_blk
        per_graph(MN, ME),   # sd_blk
        per_graph(2, MN),    # pool_blk
        resident(Hp, 3 * Hp),  # wih_t
        resident(Hp, 3 * Hp),  # whh_t
        resident(Hp, 3 * Hp),  # wmisc
        resident(8, 3 * Hp),   # ptab
        pl.BlockSpec(memory_space=pltpu.MemorySpace.SMEM),  # scal
    ]
    out_specs = (
        pl.BlockSpec((1, MN, Hp), lambda g: (g, 0, 0)),
        pl.BlockSpec((1, 1, Hp), lambda g: (g, 0, 0)),
    )

    blk_in = 4 * (MN * Hp + ME * Hp + MN * Hp) + 2 * (ME * MN + MN * MN + MN * ME + 2 * MN)
    blk_out = 4 * (MN * Hp + Hp)
    wres = 2 * 3 * Hp * 3 * Hp + 4 * 8 * 3 * Hp
    vmem_limit = int(max(32 << 20, min(4 * (blk_in + blk_out) + 2 * wres, 64 << 20)))

    mm_iter = 2 * (ME * MN * Hp + ME * Hp * Hp + MN * MN * Hp + MN * ME * Hp
                   + 2 * MN * Hp * 3 * Hp)
    cost = pl.CostEstimate(
        flops=int(G * (n_iter * mm_iter + 2 * (2 * MN * Hp + 2 * Hp * Hp))),
        transcendentals=int(G * (n_iter * MN * 3 * Hp + Hp + 2)),
        bytes_accessed=int(G * (blk_in + blk_out) + wres))

    x_out_blk, gemb_blk = pl.pallas_call(
        partial(gnp_block_kernel, n_iter),
        grid=(G,),
        out_shape=(jax.ShapeDtypeStruct((G, MN, Hp), f32),
                   jax.ShapeDtypeStruct((G, 1, Hp), f32)),
        in_specs=in_specs,
        out_specs=out_specs,
        input_output_aliases={0: 0},          # reuse the x buffer for x_out
        compiler_params=pltpu.CompilerParams(
            dimension_semantics=("parallel",),
            vmem_limit_bytes=vmem_limit),
        cost_estimate=cost,
    )(x_blk, Ae_blk, Ag_blk, Se_blk, Sg_blk, sd_blk, pool_blk,
      wih_t, whh_t, wmisc, ptab, scal)

    # scatter per-graph rows back to the global node ordering (padded rows contribute nothing)
    x_out = jnp.einsum("gmn,gmh->nh", ngat, x_out_blk)
    return x_out[:, :H], gemb_blk[:, 0, :KGE]


if __name__ == "__main__":
    key = jax.random.PRNGKey(0)
    H, KGE = 32, 16
    G = 3
    nodes_per_graph = 4
    edges_per_graph = 6
    line_edges_per_graph = 8
    n_iter = 2
    N = G * nodes_per_graph
    E = G * edges_per_graph

    keys = jax.random.split(key, 8)
    x = jax.random.normal(keys[0], (N, H), jnp.float32)
    edge_attr = jax.random.normal(keys[1], (E, H), jnp.float32)
    batch = jnp.repeat(jnp.arange(G, dtype=jnp.int32), nodes_per_graph)

    # PyG-style batch: node edges stay within each graph
    goff_n = (jnp.arange(G, dtype=jnp.int32) * nodes_per_graph)[:, None]
    src = (jax.random.randint(keys[2], (G, edges_per_graph), 0, nodes_per_graph, jnp.int32)
           + goff_n).reshape(-1)
    dst = (jax.random.randint(keys[3], (G, edges_per_graph), 0, nodes_per_graph, jnp.int32)
           + goff_n).reshape(-1)
    edge_index = jnp.stack([src, dst])

    # line-graph edges (edge -> edge) also stay within each graph
    goff_e = (jnp.arange(G, dtype=jnp.int32) * edges_per_graph)[:, None]
    lsrc = (jax.random.randint(keys[4], (G, line_edges_per_graph), 0, edges_per_graph, jnp.int32)
            + goff_e).reshape(-1)
    ldst = (jax.random.randint(keys[5], (G, line_edges_per_graph), 0, edges_per_graph, jnp.int32)
            + goff_e).reshape(-1)
    line_graph_edge_index = jnp.stack([lsrc, ldst])

    params = init_params(keys[6], H, KGE)

    # static per-graph block sizes (sublane aligned) known without tracing data values
    max_nodes = ((nodes_per_graph + 7) // 8) * 8
    max_edges = ((edges_per_graph + 7) // 8) * 8

    x_out, graph_emb = gnp_block_forward(
        params, x, edge_index, edge_attr, batch, line_graph_edge_index,
        num_graphs=G, max_nodes=max_nodes, max_edges=max_edges, n_iter=n_iter)
    jax.block_until_ready((x_out, graph_emb))

    assert x_out.shape == (N, H) and graph_emb.shape == (G, KGE)
    assert bool(jnp.all(jnp.isfinite(x_out))) and bool(jnp.all(jnp.isfinite(graph_emb)))
    print("KERNEL_OK")
</pallas_src>

<mosaic_0001>
module attributes {stable_mosaic.version = 11 : i64} {
  func.func @gnp_block_kernel(%arg0: i32, %arg1: memref<1x8x128xf32, #tpu.memory_space<vmem>>, %arg2: memref<1x8x128xf32, #tpu.memory_space<vmem>>, %arg3: memref<1x8x8xbf16, #tpu.memory_space<vmem>>, %arg4: memref<1x8x128xf32, #tpu.memory_space<vmem>>, %arg5: memref<1x8x8xbf16, #tpu.memory_space<vmem>>, %arg6: memref<1x8x8xbf16, #tpu.memory_space<vmem>>, %arg7: memref<1x2x8xbf16, #tpu.memory_space<vmem>>, %arg8: memref<128x384xbf16, #tpu.memory_space<vmem>>, %arg9: memref<128x384xbf16, #tpu.memory_space<vmem>>, %arg10: memref<128x384xbf16, #tpu.memory_space<vmem>>, %arg11: memref<8x384xf32, #tpu.memory_space<vmem>>, %arg12: memref<3xf32, #tpu.memory_space<smem>>, %arg13: memref<1x8x128xf32, #tpu.memory_space<vmem>>, %arg14: memref<1x1x128xf32, #tpu.memory_space<vmem>>) attributes {dimension_semantics = [#tpu.dimension_semantics<parallel>], iteration_bounds = array<i64: 3>, scalar_prefetch = 0 : i64, scratch_operands = 0 : i64, tpu.core_type = #tpu.core_type<tc>, window_params = [{transform_indices = @transform_0, window_bounds = array<i64: 1, 8, 128>}, {transform_indices = @transform_1, window_bounds = array<i64: 1, 8, 128>}, {transform_indices = @transform_2, window_bounds = array<i64: 1, 8, 8>}, {transform_indices = @transform_3, window_bounds = array<i64: 1, 8, 128>}, {transform_indices = @transform_4, window_bounds = array<i64: 1, 8, 8>}, {transform_indices = @transform_5, window_bounds = array<i64: 1, 8, 8>}, {transform_indices = @transform_6, window_bounds = array<i64: 1, 2, 8>}, {pipeline_mode = #tpu.pipeline_mode<synchronous>, transform_indices = @transform_7, window_bounds = array<i64: 128, 384>}, {pipeline_mode = #tpu.pipeline_mode<synchronous>, transform_indices = @transform_8, window_bounds = array<i64: 128, 384>}, {pipeline_mode = #tpu.pipeline_mode<synchronous>, transform_indices = @transform_9, window_bounds = array<i64: 128, 384>}, {pipeline_mode = #tpu.pipeline_mode<synchronous>, transform_indices = @transform_10, window_bounds = array<i64: 8, 384>}, {transform_indices = @transform_11, window_bounds = array<i64: 3>}, {transform_indices = @transform_12, window_bounds = array<i64: 1, 8, 128>}, {transform_indices = @transform_13, window_bounds = array<i64: 1, 1, 128>}]} {
    %c0 = arith.constant 0 : index
    %c0_0 = arith.constant 0 : index
    %c0_1 = arith.constant 0 : index
    %0 = vector.load %arg1[%c0, %c0_0, %c0_1] : memref<1x8x128xf32, #tpu.memory_space<vmem>>, vector<1x8x128xf32>
    %1 = vector.shape_cast %0 : vector<1x8x128xf32> to vector<8x128xf32>
    %c0_2 = arith.constant 0 : index
    %c0_3 = arith.constant 0 : index
    %c0_4 = arith.constant 0 : index
    %2 = vector.load %arg2[%c0_2, %c0_3, %c0_4] : memref<1x8x128xf32, #tpu.memory_space<vmem>>, vector<1x8x128xf32>
    %3 = vector.shape_cast %2 : vector<1x8x128xf32> to vector<8x128xf32>
    %c0_5 = arith.constant 0 : index
    %c0_6 = arith.constant 0 : index
    %c0_7 = arith.constant 0 : index
    %4 = vector.load %arg3[%c0_5, %c0_6, %c0_7] : memref<1x8x8xbf16, #tpu.memory_space<vmem>>, vector<1x8x8xbf16>
    %5 = vector.shape_cast %4 : vector<1x8x8xbf16> to vector<8x8xbf16>
    %c0_8 = arith.constant 0 : index
    %c0_9 = arith.constant 0 : index
    %c0_10 = arith.constant 0 : index
    %6 = vector.load %arg4[%c0_8, %c0_9, %c0_10] : memref<1x8x128xf32, #tpu.memory_space<vmem>>, vector<1x8x128xf32>
    %7 = vector.shape_cast %6 : vector<1x8x128xf32> to vector<8x128xf32>
    %c0_11 = arith.constant 0 : index
    %c0_12 = arith.constant 0 : index
    %c0_13 = arith.constant 0 : index
    %8 = vector.load %arg5[%c0_11, %c0_12, %c0_13] : memref<1x8x8xbf16, #tpu.memory_space<vmem>>, vector<1x8x8xbf16>
    %9 = vector.shape_cast %8 : vector<1x8x8xbf16> to vector<8x8xbf16>
    %c0_14 = arith.constant 0 : index
    %c0_15 = arith.constant 0 : index
    %c0_16 = arith.constant 0 : index
    %10 = vector.load %arg6[%c0_14, %c0_15, %c0_16] : memref<1x8x8xbf16, #tpu.memory_space<vmem>>, vector<1x8x8xbf16>
    %11 = vector.shape_cast %10 : vector<1x8x8xbf16> to vector<8x8xbf16>
    %c0_17 = arith.constant 0 : index
    %c0_18 = arith.constant 0 : index
    %c0_19 = arith.constant 0 : index
    %12 = vector.load %arg7[%c0_17, %c0_18, %c0_19] : memref<1x2x8xbf16, #tpu.memory_space<vmem>>, vector<1x2x8xbf16>
    %13 = vector.shape_cast %12 : vector<1x2x8xbf16> to vector<2x8xbf16>
    %c0_20 = arith.constant 0 : index
    %c0_21 = arith.constant 0 : index
    %14 = vector.load %arg8[%c0_20, %c0_21] : memref<128x384xbf16, #tpu.memory_space<vmem>>, vector<128x384xbf16>
    %c0_22 = arith.constant 0 : index
    %c0_23 = arith.constant 0 : index
    %15 = vector.load %arg9[%c0_22, %c0_23] : memref<128x384xbf16, #tpu.memory_space<vmem>>, vector<128x384xbf16>
    %c0_24 = arith.constant 0 : index
    %c0_25 = arith.constant 0 : index
    %16 = vector.load %arg10[%c0_24, %c0_25] : memref<128x384xbf16, #tpu.memory_space<vmem>>, vector<128x128xbf16>
    %c0_26 = arith.constant 0 : index
    %c128 = arith.constant 128 : index
    %17 = vector.load %arg10[%c0_26, %c128] : memref<128x384xbf16, #tpu.memory_space<vmem>>, vector<128x128xbf16>
    %c0_27 = arith.constant 0 : index
    %c256 = arith.constant 256 : index
    %18 = vector.load %arg10[%c0_27, %c256] : memref<128x384xbf16, #tpu.memory_space<vmem>>, vector<128x128xbf16>
    %c0_28 = arith.constant 0 : index
    %c0_29 = arith.constant 0 : index
    %19 = vector.load %arg11[%c0_28, %c0_29] : memref<8x384xf32, #tpu.memory_space<vmem>>, vector<1x128xf32>
    %20 = vector.shape_cast %19 : vector<1x128xf32> to vector<1x128xf32>
    %21 = vector.broadcast %20 : vector<1x128xf32> to vector<8x128xf32>
    %c0_30 = arith.constant 0 : index
    %c128_31 = arith.constant 128 : index
    %22 = vector.load %arg11[%c0_30, %c128_31] : memref<8x384xf32, #tpu.memory_space<vmem>>, vector<1x128xf32>
    %23 = vector.shape_cast %22 : vector<1x128xf32> to vector<1x128xf32>
    %24 = vector.broadcast %23 : vector<1x128xf32> to vector<8x128xf32>
    %c0_32 = arith.constant 0 : index
    %c256_33 = arith.constant 256 : index
    %25 = vector.load %arg11[%c0_32, %c256_33] : memref<8x384xf32, #tpu.memory_space<vmem>>, vector<1x128xf32>
    %26 = vector.shape_cast %25 : vector<1x128xf32> to vector<1x128xf32>
    %27 = vector.broadcast %26 : vector<1x128xf32> to vector<8x128xf32>
    %c1 = arith.constant 1 : index
    %c0_34 = arith.constant 0 : index
    %28 = vector.load %arg11[%c1, %c0_34] : memref<8x384xf32, #tpu.memory_space<vmem>>, vector<1x384xf32>
    %29 = vector.shape_cast %28 : vector<1x384xf32> to vector<1x384xf32>
    %30 = vector.broadcast %29 : vector<1x384xf32> to vector<8x384xf32>
    %c2 = arith.constant 2 : index
    %c0_35 = arith.constant 0 : index
    %31 = vector.load %arg11[%c2, %c0_35] : memref<8x384xf32, #tpu.memory_space<vmem>>, vector<1x384xf32>
    %32 = vector.shape_cast %31 : vector<1x384xf32> to vector<1x384xf32>
    %33 = vector.broadcast %32 : vector<1x384xf32> to vector<8x384xf32>
    %c3 = arith.constant 3 : index
    %c0_36 = arith.constant 0 : index
    %34 = vector.load %arg11[%c3, %c0_36] : memref<8x384xf32, #tpu.memory_space<vmem>>, vector<1x128xf32>
    %c4 = arith.constant 4 : index
    %c0_37 = arith.constant 0 : index
    %35 = vector.load %arg11[%c4, %c0_37] : memref<8x384xf32, #tpu.memory_space<vmem>>, vector<1x128xf32>
    %c5 = arith.constant 5 : index
    %c0_38 = arith.constant 0 : index
    %36 = vector.load %arg11[%c5, %c0_38] : memref<8x384xf32, #tpu.memory_space<vmem>>, vector<1x128xf32>
    %c0_39 = arith.constant 0 : index
    %37 = memref.load %arg12[%c0_39] : memref<3xf32, #tpu.memory_space<smem>>
    %c1_40 = arith.constant 1 : index
    %38 = memref.load %arg12[%c1_40] : memref<3xf32, #tpu.memory_space<smem>>
    %c2_41 = arith.constant 2 : index
    %39 = memref.load %arg12[%c2_41] : memref<3xf32, #tpu.memory_space<smem>>
    %40 = arith.truncf %1 : vector<8x128xf32> to vector<8x128xbf16>
    %cst = arith.constant dense<0.000000e+00> : vector<8x128xf32>
    %41 = tpu.matmul %5, %40, %cst {dimension_numbers = #tpu.dot_dimension_numbers<[1], [0], [0], [1], [0, 0, 1, 1], [], []>} : vector<8x8xbf16>, vector<8x128xbf16>, vector<8x128xf32> -> vector<8x128xf32>
    %42 = arith.addf %3, %41 : vector<8x128xf32>
    %43 = arith.truncf %42 : vector<8x128xf32> to vector<8x128xbf16>
    %cst_42 = arith.constant dense<0.000000e+00> : vector<8x128xf32>
    %44 = tpu.matmul %43, %16, %cst_42 {dimension_numbers = #tpu.dot_dimension_numbers<[1], [0], [0], [1], [0, 0, 1, 1], [], []>} : vector<8x128xbf16>, vector<128x128xbf16>, vector<8x128xf32> -> vector<8x128xf32>
    %45 = arith.addf %44, %21 : vector<8x128xf32>
    %cst_43 = arith.constant 0.000000e+00 : f32
    %46 = vector.broadcast %cst_43 : f32 to vector<8x128xf32>
    %47 = arith.maximumf %45, %46 : vector<8x128xf32>
    %cst_44 = arith.constant 0.000000e+00 : f32
    %48 = vector.broadcast %cst_44 : f32 to vector<8x128xf32>
    %49 = arith.minimumf %45, %48 : vector<8x128xf32>
    %50 = vector.broadcast %37 : f32 to vector<8x128xf32>
    %51 = arith.mulf %50, %49 : vector<8x128xf32>
    %52 = arith.addf %47, %51 : vector<8x128xf32>
    %53 = arith.mulf %52, %24 : vector<8x128xf32>
    %54 = arith.addf %53, %27 : vector<8x128xf32>
    %cst_45 = arith.constant dense<0.000000e+00> : vector<8x128xf32>
    %55 = tpu.matmul %9, %40, %cst_45 {dimension_numbers = #tpu.dot_dimension_numbers<[1], [0], [0], [1], [0, 0, 1, 1], [], []>} : vector<8x8xbf16>, vector<8x128xbf16>, vector<8x128xf32> -> vector<8x128xf32>
    %56 = arith.addf %7, %55 : vector<8x128xf32>
    %57 = arith.truncf %54 : vector<8x128xf32> to vector<8x128xbf16>
    %cst_46 = arith.constant dense<0.000000e+00> : vector<8x128xf32>
    %58 = tpu.matmul %11, %57, %cst_46 {dimension_numbers = #tpu.dot_dimension_numbers<[1], [0], [0], [1], [0, 0, 1, 1], [], []>} : vector<8x8xbf16>, vector<8x128xbf16>, vector<8x128xf32> -> vector<8x128xf32>
    %59 = arith.addf %56, %58 : vector<8x128xf32>
    %60 = arith.truncf %59 : vector<8x128xf32> to vector<8x128xbf16>
    %cst_47 = arith.constant dense<0.000000e+00> : vector<8x384xf32>
    %61 = tpu.matmul %60, %14, %cst_47 {dimension_numbers = #tpu.dot_dimension_numbers<[1], [0], [0], [1], [0, 0, 1, 1], [], []>} : vector<8x128xbf16>, vector<128x384xbf16>, vector<8x384xf32> -> vector<8x384xf32>
    %62 = arith.addf %61, %30 : vector<8x384xf32>
    %cst_48 = arith.constant dense<0.000000e+00> : vector<8x384xf32>
    %63 = tpu.matmul %40, %15, %cst_48 {dimension_numbers = #tpu.dot_dimension_numbers<[1], [0], [0], [1], [0, 0, 1, 1], [], []>} : vector<8x128xbf16>, vector<128x384xbf16>, vector<8x384xf32> -> vector<8x384xf32>
    %64 = arith.addf %63, %33 : vector<8x384xf32>
    %65 = vector.extract_strided_slice %62 {offsets = [0, 0], sizes = [8, 128], strides = [1, 1]} : vector<8x384xf32> to vector<8x128xf32>
    %66 = vector.extract_strided_slice %64 {offsets = [0, 0], sizes = [8, 128], strides = [1, 1]} : vector<8x384xf32> to vector<8x128xf32>
    %67 = arith.addf %65, %66 : vector<8x128xf32>
    %68 = arith.negf %67 : vector<8x128xf32>
    %69 = math.exp %68 : vector<8x128xf32>
    %cst_49 = arith.constant 1.000000e+00 : f32
    %70 = vector.broadcast %cst_49 : f32 to vector<8x128xf32>
    %71 = arith.addf %70, %69 : vector<8x128xf32>
    %72 = arith.divf %70, %71 : vector<8x128xf32>
    %73 = vector.extract_strided_slice %62 {offsets = [0, 128], sizes = [8, 128], strides = [1, 1]} : vector<8x384xf32> to vector<8x128xf32>
    %74 = vector.extract_strided_slice %64 {offsets = [0, 128], sizes = [8, 128], strides = [1, 1]} : vector<8x384xf32> to vector<8x128xf32>
    %75 = arith.addf %73, %74 : vector<8x128xf32>
    %76 = arith.negf %75 : vector<8x128xf32>
    %77 = math.exp %76 : vector<8x128xf32>
    %cst_50 = arith.constant 1.000000e+00 : f32
    %78 = vector.broadcast %cst_50 : f32 to vector<8x128xf32>
    %79 = arith.addf %78, %77 : vector<8x128xf32>
    %80 = arith.divf %78, %79 : vector<8x128xf32>
    %81 = vector.extract_strided_slice %62 {offsets = [0, 256], sizes = [8, 128], strides = [1, 1]} : vector<8x384xf32> to vector<8x128xf32>
    %82 = vector.extract_strided_slice %64 {offsets = [0, 256], sizes = [8, 128], strides = [1, 1]} : vector<8x384xf32> to vector<8x128xf32>
    %83 = arith.mulf %72, %82 : vector<8x128xf32>
    %84 = arith.addf %81, %83 : vector<8x128xf32>
    %85 = math.tanh %84 : vector<8x128xf32>
    %cst_51 = arith.constant 1.000000e+00 : f32
    %86 = vector.broadcast %cst_51 : f32 to vector<8x128xf32>
    %87 = arith.subf %86, %80 : vector<8x128xf32>
    %88 = arith.mulf %87, %85 : vector<8x128xf32>
    %89 = arith.mulf %80, %1 : vector<8x128xf32>
    %90 = arith.addf %88, %89 : vector<8x128xf32>
    %91 = arith.truncf %90 : vector<8x128xf32> to vector<8x128xbf16>
    %cst_52 = arith.constant dense<0.000000e+00> : vector<8x128xf32>
    %92 = tpu.matmul %5, %91, %cst_52 {dimension_numbers = #tpu.dot_dimension_numbers<[1], [0], [0], [1], [0, 0, 1, 1], [], []>} : vector<8x8xbf16>, vector<8x128xbf16>, vector<8x128xf32> -> vector<8x128xf32>
    %93 = arith.addf %3, %92 : vector<8x128xf32>
    %94 = arith.truncf %93 : vector<8x128xf32> to vector<8x128xbf16>
    %cst_53 = arith.constant dense<0.000000e+00> : vector<8x128xf32>
    %95 = tpu.matmul %94, %16, %cst_53 {dimension_numbers = #tpu.dot_dimension_numbers<[1], [0], [0], [1], [0, 0, 1, 1], [], []>} : vector<8x128xbf16>, vector<128x128xbf16>, vector<8x128xf32> -> vector<8x128xf32>
    %96 = arith.addf %95, %21 : vector<8x128xf32>
    %cst_54 = arith.constant 0.000000e+00 : f32
    %97 = vector.broadcast %cst_54 : f32 to vector<8x128xf32>
    %98 = arith.maximumf %96, %97 : vector<8x128xf32>
    %cst_55 = arith.constant 0.000000e+00 : f32
    %99 = vector.broadcast %cst_55 : f32 to vector<8x128xf32>
    %100 = arith.minimumf %96, %99 : vector<8x128xf32>
    %101 = vector.broadcast %37 : f32 to vector<8x128xf32>
    %102 = arith.mulf %101, %100 : vector<8x128xf32>
    %103 = arith.addf %98, %102 : vector<8x128xf32>
    %104 = arith.mulf %103, %24 : vector<8x128xf32>
    %105 = arith.addf %104, %27 : vector<8x128xf32>
    %cst_56 = arith.constant dense<0.000000e+00> : vector<8x128xf32>
    %106 = tpu.matmul %9, %91, %cst_56 {dimension_numbers = #tpu.dot_dimension_numbers<[1], [0], [0], [1], [0, 0, 1, 1], [], []>} : vector<8x8xbf16>, vector<8x128xbf16>, vector<8x128xf32> -> vector<8x128xf32>
    %107 = arith.addf %7, %106 : vector<8x128xf32>
    %108 = arith.truncf %105 : vector<8x128xf32> to vector<8x128xbf16>
    %cst_57 = arith.constant dense<0.000000e+00> : vector<8x128xf32>
    %109 = tpu.matmul %11, %108, %cst_57 {dimension_numbers = #tpu.dot_dimension_numbers<[1], [0], [0], [1], [0, 0, 1, 1], [], []>} : vector<8x8xbf16>, vector<8x128xbf16>, vector<8x128xf32> -> vector<8x128xf32>
    %110 = arith.addf %107, %109 : vector<8x128xf32>
    %111 = arith.truncf %110 : vector<8x128xf32> to vector<8x128xbf16>
    %cst_58 = arith.constant dense<0.000000e+00> : vector<8x384xf32>
    %112 = tpu.matmul %111, %14, %cst_58 {dimension_numbers = #tpu.dot_dimension_numbers<[1], [0], [0], [1], [0, 0, 1, 1], [], []>} : vector<8x128xbf16>, vector<128x384xbf16>, vector<8x384xf32> -> vector<8x384xf32>
    %113 = arith.addf %112, %30 : vector<8x384xf32>
    %cst_59 = arith.constant dense<0.000000e+00> : vector<8x384xf32>
    %114 = tpu.matmul %91, %15, %cst_59 {dimension_numbers = #tpu.dot_dimension_numbers<[1], [0], [0], [1], [0, 0, 1, 1], [], []>} : vector<8x128xbf16>, vector<128x384xbf16>, vector<8x384xf32> -> vector<8x384xf32>
    %115 = arith.addf %114, %33 : vector<8x384xf32>
    %116 = vector.extract_strided_slice %113 {offsets = [0, 0], sizes = [8, 128], strides = [1, 1]} : vector<8x384xf32> to vector<8x128xf32>
    %117 = vector.extract_strided_slice %115 {offsets = [0, 0], sizes = [8, 128], strides = [1, 1]} : vector<8x384xf32> to vector<8x128xf32>
    %118 = arith.addf %116, %117 : vector<8x128xf32>
    %119 = arith.negf %118 : vector<8x128xf32>
    %120 = math.exp %119 : vector<8x128xf32>
    %cst_60 = arith.constant 1.000000e+00 : f32
    %121 = vector.broadcast %cst_60 : f32 to vector<8x128xf32>
    %122 = arith.addf %121, %120 : vector<8x128xf32>
    %123 = arith.divf %121, %122 : vector<8x128xf32>
    %124 = vector.extract_strided_slice %113 {offsets = [0, 128], sizes = [8, 128], strides = [1, 1]} : vector<8x384xf32> to vector<8x128xf32>
    %125 = vector.extract_strided_slice %115 {offsets = [0, 128], sizes = [8, 128], strides = [1, 1]} : vector<8x384xf32> to vector<8x128xf32>
    %126 = arith.addf %124, %125 : vector<8x128xf32>
    %127 = arith.negf %126 : vector<8x128xf32>
    %128 = math.exp %127 : vector<8x128xf32>
    %cst_61 = arith.constant 1.000000e+00 : f32
    %129 = vector.broadcast %cst_61 : f32 to vector<8x128xf32>
    %130 = arith.addf %129, %128 : vector<8x128xf32>
    %131 = arith.divf %129, %130 : vector<8x128xf32>
    %132 = vector.extract_strided_slice %113 {offsets = [0, 256], sizes = [8, 128], strides = [1, 1]} : vector<8x384xf32> to vector<8x128xf32>
    %133 = vector.extract_strided_slice %115 {offsets = [0, 256], sizes = [8, 128], strides = [1, 1]} : vector<8x384xf32> to vector<8x128xf32>
    %134 = arith.mulf %123, %133 : vector<8x128xf32>
    %135 = arith.addf %132, %134 : vector<8x128xf32>
    %136 = math.tanh %135 : vector<8x128xf32>
    %cst_62 = arith.constant 1.000000e+00 : f32
    %137 = vector.broadcast %cst_62 : f32 to vector<8x128xf32>
    %138 = arith.subf %137, %131 : vector<8x128xf32>
    %139 = arith.mulf %138, %136 : vector<8x128xf32>
    %140 = arith.mulf %131, %90 : vector<8x128xf32>
    %141 = arith.addf %139, %140 : vector<8x128xf32>
    %142 = arith.truncf %141 : vector<8x128xf32> to vector<8x128xbf16>
    %cst_63 = arith.constant dense<0.000000e+00> : vector<2x128xf32>
    %143 = tpu.matmul %13, %142, %cst_63 {dimension_numbers = #tpu.dot_dimension_numbers<[1], [0], [0], [1], [0, 0, 1, 1], [], []>} : vector<2x8xbf16>, vector<8x128xbf16>, vector<2x128xf32> -> vector<2x128xf32>
    %144 = vector.extract_strided_slice %143 {offsets = [0, 0], sizes = [1, 128], strides = [1, 1]} : vector<2x128xf32> to vector<1x128xf32>
    %145 = vector.extract_strided_slice %143 {offsets = [1, 0], sizes = [1, 128], strides = [1, 1]} : vector<2x128xf32> to vector<1x128xf32>
    %146 = arith.truncf %145 : vector<1x128xf32> to vector<1x128xbf16>
    %cst_64 = arith.constant dense<0.000000e+00> : vector<1x128xf32>
    %147 = tpu.matmul %146, %17, %cst_64 {dimension_numbers = #tpu.dot_dimension_numbers<[1], [0], [0], [1], [0, 0, 1, 1], [], []>} : vector<1x128xbf16>, vector<128x128xbf16>, vector<1x128xf32> -> vector<1x128xf32>
    %148 = arith.addf %147, %34 : vector<1x128xf32>
    %cst_65 = arith.constant 0.000000e+00 : f32
    %149 = vector.broadcast %cst_65 : f32 to vector<1x128xf32>
    %150 = arith.maximumf %148, %149 : vector<1x128xf32>
    %cst_66 = arith.constant 0.000000e+00 : f32
    %151 = vector.broadcast %cst_66 : f32 to vector<1x128xf32>
    %152 = arith.minimumf %148, %151 : vector<1x128xf32>
    %153 = vector.broadcast %38 : f32 to vector<1x128xf32>
    %154 = arith.mulf %153, %152 : vector<1x128xf32>
    %155 = arith.addf %150, %154 : vector<1x128xf32>
    %156 = arith.mulf %155, %35 : vector<1x128xf32>
    %cst_67 = arith.constant dense<0.000000e+00> : vector<1xf32>
    %157 = vector.multi_reduction <add>, %156, %cst_67 [1] : vector<1x128xf32> to vector<1xf32>
    %158 = vector.shape_cast %157 : vector<1xf32> to vector<1x1xf32>
    %159 = vector.broadcast %39 : f32 to vector<1x1xf32>
    %160 = arith.addf %158, %159 : vector<1x1xf32>
    %161 = arith.negf %160 : vector<1x1xf32>
    %162 = math.exp %161 : vector<1x1xf32>
    %cst_68 = arith.constant 1.000000e+00 : f32
    %163 = vector.broadcast %cst_68 : f32 to vector<1x1xf32>
    %164 = arith.addf %163, %162 : vector<1x1xf32>
    %165 = arith.divf %163, %164 : vector<1x1xf32>
    %166 = vector.broadcast %165 : vector<1x1xf32> to vector<1x128xf32>
    %167 = arith.mulf %166, %144 : vector<1x128xf32>
    %168 = arith.truncf %167 : vector<1x128xf32> to vector<1x128xbf16>
    %cst_69 = arith.constant dense<0.000000e+00> : vector<1x128xf32>
    %169 = tpu.matmul %168, %18, %cst_69 {dimension_numbers = #tpu.dot_dimension_numbers<[1], [0], [0], [1], [0, 0, 1, 1], [], []>} : vector<1x128xbf16>, vector<128x128xbf16>, vector<1x128xf32> -> vector<1x128xf32>
    %170 = arith.addf %169, %36 : vector<1x128xf32>
    %c0_70 = arith.constant 0 : index
    %c0_71 = arith.constant 0 : index
    %c0_72 = arith.constant 0 : index
    %171 = vector.load %arg13[%c0_70, %c0_71, %c0_72] : memref<1x8x128xf32, #tpu.memory_space<vmem>>, vector<1x8x128xf32>
    %172 = vector.shape_cast %171 : vector<1x8x128xf32> to vector<8x128xf32>
    %173 = vector.shape_cast %141 : vector<8x128xf32> to vector<1x8x128xf32>
    tpu.vector_store %arg13[%c0_70, %c0_71, %c0_72], %173 {strides = array<i32>} : memref<1x8x128xf32, #tpu.memory_space<vmem>>, vector<1x8x128xf32>,
    %c0_73 = arith.constant 0 : index
    %c0_74 = arith.constant 0 : index
    %c0_75 = arith.constant 0 : index
    %174 = vector.load %arg14[%c0_73, %c0_74, %c0_75] : memref<1x1x128xf32, #tpu.memory_space<vmem>>, vector<1x1x128xf32>
    %175 = vector.shape_cast %174 : vector<1x1x128xf32> to vector<1x128xf32>
    %176 = vector.shape_cast %170 : vector<1x128xf32> to vector<1x1x128xf32>
    tpu.vector_store %arg14[%c0_73, %c0_74, %c0_75], %176 {strides = array<i32>} : memref<1x1x128xf32, #tpu.memory_space<vmem>>, vector<1x1x128xf32>,
    return
  }
  func.func @transform_0(%arg0: i32) -> (i32, i32, i32) {
    %c0_i32 = arith.constant 0 : i32
    %c0_i32_0 = arith.constant 0 : i32
    %c0_i32_1 = arith.constant 0 : i32
    return %arg0, %c0_i32, %c0_i32_0 : i32, i32, i32
  }
  func.func @transform_1(%arg0: i32) -> (i32, i32, i32) {
    %c0_i32 = arith.constant 0 : i32
    %c0_i32_0 = arith.constant 0 : i32
    %c0_i32_1 = arith.constant 0 : i32
    return %arg0, %c0_i32, %c0_i32_0 : i32, i32, i32
  }
  func.func @transform_2(%arg0: i32) -> (i32, i32, i32) {
    %c0_i32 = arith.constant 0 : i32
    %c0_i32_0 = arith.constant 0 : i32
    %c0_i32_1 = arith.constant 0 : i32
    return %arg0, %c0_i32, %c0_i32_0 : i32, i32, i32
  }
  func.func @transform_3(%arg0: i32) -> (i32, i32, i32) {
    %c0_i32 = arith.constant 0 : i32
    %c0_i32_0 = arith.constant 0 : i32
    %c0_i32_1 = arith.constant 0 : i32
    return %arg0, %c0_i32, %c0_i32_0 : i32, i32, i32
  }
  func.func @transform_4(%arg0: i32) -> (i32, i32, i32) {
    %c0_i32 = arith.constant 0 : i32
    %c0_i32_0 = arith.constant 0 : i32
    %c0_i32_1 = arith.constant 0 : i32
    return %arg0, %c0_i32, %c0_i32_0 : i32, i32, i32
  }
  func.func @transform_5(%arg0: i32) -> (i32, i32, i32) {
    %c0_i32 = arith.constant 0 : i32
    %c0_i32_0 = arith.constant 0 : i32
    %c0_i32_1 = arith.constant 0 : i32
    return %arg0, %c0_i32, %c0_i32_0 : i32, i32, i32
  }
  func.func @transform_6(%arg0: i32) -> (i32, i32, i32) {
    %c0_i32 = arith.constant 0 : i32
    %c0_i32_0 = arith.constant 0 : i32
    %c0_i32_1 = arith.constant 0 : i32
    return %arg0, %c0_i32, %c0_i32_0 : i32, i32, i32
  }
  func.func @transform_7(%arg0: i32) -> (i32, i32) {
    %c0_i32 = arith.constant 0 : i32
    %c0_i32_0 = arith.constant 0 : i32
    %c0_i32_1 = arith.constant 0 : i32
    return %c0_i32, %c0_i32_0 : i32, i32
  }
  func.func @transform_8(%arg0: i32) -> (i32, i32) {
    %c0_i32 = arith.constant 0 : i32
    %c0_i32_0 = arith.constant 0 : i32
    %c0_i32_1 = arith.constant 0 : i32
    return %c0_i32, %c0_i32_0 : i32, i32
  }
  func.func @transform_9(%arg0: i32) -> (i32, i32) {
    %c0_i32 = arith.constant 0 : i32
    %c0_i32_0 = arith.constant 0 : i32
    %c0_i32_1 = arith.constant 0 : i32
    return %c0_i32, %c0_i32_0 : i32, i32
  }
  func.func @transform_10(%arg0: i32) -> (i32, i32) {
    %c0_i32 = arith.constant 0 : i32
    %c0_i32_0 = arith.constant 0 : i32
    %c0_i32_1 = arith.constant 0 : i32
    return %c0_i32, %c0_i32_0 : i32, i32
  }
  func.func @transform_11(%arg0: i32) -> i32 {
    %c0_i32 = arith.constant 0 : i32
    %c0_i32_0 = arith.constant 0 : i32
    return %c0_i32 : i32
  }
  func.func @transform_12(%arg0: i32) -> (i32, i32, i32) {
    %c0_i32 = arith.constant 0 : i32
    %c0_i32_0 = arith.constant 0 : i32
    %c0_i32_1 = arith.constant 0 : i32
    return %arg0, %c0_i32, %c0_i32_0 : i32, i32, i32
  }
  func.func @transform_13(%arg0: i32) -> (i32, i32, i32) {
    %c0_i32 = arith.constant 0 : i32
    %c0_i32_0 = arith.constant 0 : i32
    %c0_i32_1 = arith.constant 0 : i32
    return %arg0, %c0_i32, %c0_i32_0 : i32, i32, i32
  }
}

</mosaic_0001>

<bundles_post_ra>
// kernel: gnp_block_forward.1
= control target key start
LH: loop header
LB: loop body
LE: loop exit
PB: predicated region body
PF: predicated region fallthrough
CT: control target
= control target key end

     0   :  { %19 = vsyncpa [#allocation3], 0  ;;  %s2825_s25 = smov 0   ;;  %s3558_s0 = inlined_call_operand.vmem [shape: f32[3,8,128], index: 0, kind: input, shape index: {}, may-alias: {0,12}]   ;;  %s3559_s1 = inlined_call_operand.vmem [shape: f32[3,8,128], index: 1, kind: input, shape index: {}]   ;;  %s3560_s2 = inlined_call_operand.vmem [shape: bf16[3,8,8], index: 2, kind: input, shape index: {}]   ;;  %s3561_s3 = inlined_call_operand.vmem [shape: f32[3,8,128], index: 3, kind: input, shape index: {}]   ;;  %s3562_s4 = inlined_call_operand.vmem [shape: bf16[3,8,8], index: 4, kind: input, shape index: {}]   ;;  %s3563_s5 = inlined_call_operand.vmem [shape: bf16[3,8,8], index: 5, kind: input, shape index: {}]   ;;  %s3564_s6 = inlined_call_operand.vmem [shape: bf16[3,2,8], index: 6, kind: input, shape index: {}]   ;;  %s3565_s7 = inlined_call_operand.vmem [shape: bf16[128,384], index: 7, kind: input, shape index: {}]   ;;  %s3566_s8 = inlined_call_operand.vmem [shape: bf16[128,384], index: 8, kind: input, shape index: {}]   ;;  %s3567_s9 = inlined_call_operand.vmem [shape: bf16[128,384], index: 9, kind: input, shape index: {}]   ;;  %s3568_s10 = inlined_call_operand.vmem [shape: f32[8,384], index: 10, kind: input, shape index: {}]   ;;  %s3569_s11 = inlined_call_operand.vmem [shape: f32[3], index: 11, kind: input, shape index: {}]   ;;  %s3570_s12 = inlined_call_operand.vmem [shape: f32[3,8,128], index: 12, kind: output, shape index: {0}, may-alias: {0,12}]   ;;  %s3571_s13 = inlined_call_operand.vmem [shape: f32[3,1,128], index: 13, kind: output, shape index: {1}]  }
   0x1 LB: > { %s2831_s26 = sadd.s32 4294967295, %s2749_s25   ;;  %p2174_p0 = scmp.ge.s32.totalorder %s2749_s25, 1  ;;  %s2749_s25 = sphi %s2825_s25, %s25_s25  }
   0x2   : > { %p369_p1 = scmp.lt.s32.totalorder %s2749_s25, 4  ;;  %s394_s29 = sshll.u32 %s3569_s11, 4  ;;  %s395_s29 = int_to_ptr.vmem [resolvable:$true] %s394_s29 }
   0x3   : > { %p2598_p3 = scmp.eq.s32.totalorder %s2831_s26, 0  ;;  %s2724_s14 = scalar_lea.vmem %s395_s29, 16 }
   0x4   : > { %p2838_p2 = pnand %p2174_p0, %p369_p1  ;;  %p2725_p6 = scmp.ne.s32.totalorder %s395_s29, %s2724_s14 }
   0x5   : > { %p2732_p10 = scmp.lt.s32.totalorder %s395_s29, %s395_s29  ;;  %p2733_p11 = scmp.lt.s32.totalorder %s2724_s14, %s2724_s14 }
   0x6   : > { %p2594_p4 = pneg %p2838_p2 }
   0x7   : > { %p2734_p12 = por %p2733_p11, %p2732_p10 }
   0x8   : > { %p2595_p5 = pnand %p2598_p3, %p2594_p4 }
   0xa   : > { %p2726_p7 = pneg %p2595_p5 }
   0xc   : > { %p2727_p8 = pnand %p2726_p7, %p2725_p6 }
   0xe   : > { %p2728_p9 = pneg %p2727_p8 }
  0x10   : > { %p2735_p13 = pnand %p2734_p12, %p2728_p9 }
  0x12   : > { %2738 = shalt.err (!%p2735_p13)
}
  0x13   : > { %s2751_s15 = smov [#allocation2]   ;;  %455 = sbr.rel (%p2838_p2) target bundleno = 2787 (0xae3), region = 68 }
  0x14   : > { %2597 = dma.vmem_to_smem (!%p2595_p5), %s395_s29, 16, %s2751_s15, [#allocation3]  }
  0x1a   : > { %2744 = dma.done.wait (%p2598_p3), [#allocation3], 16  }
  0x1b   : > { %2746 = vsyncadd (%p2598_p3), [#allocation3], 4294967280 }
  0x1c   : > { %461 = sfence }
  0x1d   : > { %p524_p0 = scmp.lt.s32.totalorder %s2831_s26, 2  ;;  %v3575_v0 = vmov 0.0   ;;  %vm2753_vm0 = vmmov 0   ;;  %v2860_v1 = vld [vmem:[%s3567_s9] ss:$12 sps:$4 sm:$0xff]   ;;  %vm728_vm1 = vcmask 1043456  }
  0x1e   : > { %2362 = vmatprep.subr.bf16.mxu0 %v3575_v0  ;;  %2364 = vmatprep.mubr.msk.bf16.mxu0 %vm2753_vm0, %v3575_v0  ;;  %v2872_v2 = vld [vmem:[%s3567_s9 + $0x18] ss:$12 sps:$4 sm:$0xff]   ;;  %v2899_v5 = vld [vmem:[%s3567_s9 + $0x30] ss:$12 sps:$4 sm:$0xff]   ;;  %vm724_vm2 = vcmask 64512   ;;  %s3017_s19 = sld [smem:[#allocation2]] }
  0x1f   : > { %s3657_s26 = smov (!%p524_p0, %s2831_s26), 2  ;;  %2368 = vmatprep.subr.bf16.mxu1 %v3575_v0  ;;  %2384 = vmatprep.mubr.msk.bf16.mxu1 %vm2753_vm0, %v3575_v0  ;;  %v2909_v8 = vld [vmem:[%s3567_s9 + $0x48] ss:$12 sps:$4 sm:$0xff]   ;;  %v2919_v9 = vld [vmem:[%s3567_s9 + $0x60] ss:$12 sps:$4 sm:$0xff]   ;;  %s2188_s23 = sld [smem:[#allocation2 + $0x1]] }
  0x20   : > { %2369 = vmatpush3.bf16.msra.mxu1 %v2860_v1  ;;  %s2875_s20 = sshll.u32 %s3657_s26, 3  ;;  %s2878_s21 = sshll.u32 %s3657_s26, 2  ;;  %v2929_v10 = vld [vmem:[%s3567_s9 + $0x78] ss:$12 sps:$4 sm:$0xff]   ;;  %v2936_v11 = vld [vmem:[%s3567_s9 + $0x90] ss:$12 sps:$4 sm:$0xff]  }
  0x21   : > { %2370 = vmatprep.subr.bf16.mxu1 %v3575_v0  ;;  %s527_s24 = scalar_lea.vmem %s3558_s0, %s2875_s20  ;;  %s535_s29 = scalar_lea.vmem %s3560_s2, %s2878_s21  ;;  %v2945_v12 = vld [vmem:[%s3567_s9 + $0xa8] ss:$12 sps:$4 sm:$0xff]   ;;  %v2978_v22 = vld [vmem:[%s3565_s7 + $0x20] ss:$12 sps:$4 sm:$0xff]   ;;  %v2985_v23 = vld [vmem:[%s3565_s7 + $0x38] ss:$12 sps:$4 sm:$0xff]  }
  0x22   : > { %v2885_v3 = vld [vmem:[%s527_s24] sm:$0xff]  ;;  %s531_s14 = scalar_lea.vmem %s3559_s1, %s2875_s20  ;;  %s543_s17 = scalar_lea.vmem %s3562_s4, %s2878_s21  ;;  %v2971_v21 = vld [vmem:[%s3565_s7 + $0x8] ss:$12 sps:$4 sm:$0xff]   ;;  %v2992_v24 = vld [vmem:[%s3565_s7 + $0x50] ss:$12 sps:$4 sm:$0xff]   ;;  %vm1909_vm3 = vcmask 1040384  }
  0x23   : > { %v2893_v4 = vpack.c.bf16 %v2885_v3, %v2885_v3  ;;  %v2904_v7 = vld [vmem:[%s535_s29] sm:$0xf]  ;;  %v2999_v25 = vld [vmem:[%s3565_s7 + $0x68] ss:$12 sps:$4 sm:$0xff]   ;;  %v3013_v27 = vld [vmem:[%s3565_s7 + $0x98] ss:$12 sps:$4 sm:$0xff]   ;;  %s547_s15 = scalar_lea.vmem %s3563_s5, %s2878_s21  ;;  %s550_s18 = scalar_lea.vmem %s3564_s6, %s3657_s26 }
  0x24   : > { %2371 = vmatpush3.bf16.msra.mxu1 %v2872_v2  ;;  %v2953_v13 = vld [vmem:[%s531_s14] sm:$0xff]  ;;  %v3574_v32 = vstv %s3017_s19  ;;  %v3031_v38 = vld [vmem:[%s3568_s10 + $0x8] ss:$0 sm:$0xff]  ;;  %v3036_v40 = vld [vmem:[%s3568_s10 + $0x10] ss:$0 sm:$0xff]  ;;  %s2189_s29 = sld [smem:[#allocation2 + $0x2]]  ;;  %s557_s16 = scalar_lea.vmem %s3571_s13, %s3657_s26 }
  0x25   : > { %2372 = vmatprep.subr.bf16.mxu1 %v3575_v0  ;;  %v730_v6 = vsel %vm728_vm1, %v2893_v4, 0  ;;  %v2962_v20 = vld [vmem:[%s543_s17] sm:$0xf]  ;;  %v3047_v44 = vld [vmem:[%s3565_s7 + $0x4] ss:$12 sps:$4 sm:$0xff]  }
  0x26   : > { %2363 = vmatpush3.bf16.msra.mxu0 %v730_v6  ;;  %v3006_v26 = vld [vmem:[%s3565_s7 + $0x80] ss:$12 sps:$4 sm:$0xff]   ;;  %v3061_v48 = vld [vmem:[%s3565_s7 + $0x1c] ss:$12 sps:$4 sm:$0xff]   ;;  %v3069_v49 = vld [vmem:[%s3565_s7 + $0x18] ss:$12 sps:$4 sm:$0xff]  }
  0x27   : > { %2388 = vmatprep.subr.bf16.mxu0 %v3575_v0  ;;  %v3022_v28 = vld [vmem:[%s3568_s10] ss:$0 sm:$0xff]  ;;  %v3081_v51 = vld [vmem:[%s3565_s7 + $0x30] ss:$12 sps:$4 sm:$0xff]   ;;  %v3087_v52 = vld [vmem:[%s3565_s7 + $0x4c] ss:$12 sps:$4 sm:$0xff]  }
  0x28   : > { %2373 = vmatpush3.bf16.msra.mxu1 %v2899_v5  ;;  %v3050_v46 = vld [vmem:[%s547_s15] sm:$0xf]  ;;  %v3093_v53 = vld [vmem:[%s3565_s7 + $0x48] ss:$12 sps:$4 sm:$0xff]   ;;  %v3099_v54 = vld [vmem:[%s3565_s7 + $0x64] ss:$12 sps:$4 sm:$0xff]   ;;  %s539_s15 = scalar_lea.vmem %s3561_s3, %s2875_s20 }
  0x29   : > { %2374 = vmatprep.subr.bf16.mxu1 %v3575_v0  ;;  %2365 = vmatmul.mubr.msk.bf16.vlgmr.msra.gmra.mrb[0].mxu0 %vm724_vm2, %v2904_v7  ;;  %v3055_v47 = vld [vmem:[%s3565_s7] ss:$12 sps:$4 sm:$0xff]   ;;  %v3111_v56 = vld [vmem:[%s3565_s7 + $0x7c] ss:$12 sps:$4 sm:$0xff]   ;;  %v3117_v57 = vld [vmem:[%s3565_s7 + $0x78] ss:$12 sps:$4 sm:$0xff]  }
  0x2a   : > { %2389 = vmatpush3.bf16.msra.mxu0 %v730_v6  ;;  %2390 = vmatprep.mubr.msk.bf16.mxu0 %vm2753_vm0, %v3575_v0  ;;  %v3075_v50 = vld [vmem:[%s3565_s7 + $0x34] ss:$12 sps:$4 sm:$0xff]   ;;  %v3129_v59 = vld [vmem:[%s3565_s7 + $0x90] ss:$12 sps:$4 sm:$0xff]   ;;  %v3136_v60 = vld [vmem:[%s3565_s7 + $0xac] ss:$12 sps:$4 sm:$0xff]  }
  0x2b   : > { %2394 = vmatprep.subr.bf16.mxu0 %v3575_v0  ;;  %v3105_v55 = vld [vmem:[%s3565_s7 + $0x60] ss:$12 sps:$4 sm:$0xff]   ;;  %v3141_v61 = vld [vmem:[%s3565_s7 + $0xa8] ss:$12 sps:$4 sm:$0xff]   ;;  %v3147_v62 = vld [vmem:[%s3565_s7 + $0xb0] ss:$12 sps:$4 sm:$0xff]  }
  0x2c   : > { %2375 = vmatpush3.bf16.msra.mxu1 %v2909_v8  ;;  %v3123_v58 = vld [vmem:[%s3565_s7 + $0x94] ss:$12 sps:$4 sm:$0xff]   ;;  %v3154_v63 = vld [vmem:[%s3566_s8 + $0x4] ss:$12 sps:$4 sm:$0xff]   ;;  %v3572_v6 = vmov 0  }
  0x2d   : > { %2376 = vmatprep.subr.bf16.mxu1 %v3575_v0  ;;  %3603 = vst [vmem:[#allocation5_spill] sm:$0xff] %v3154_v63 }
  0x30   : > { %2377 = vmatpush3.bf16.msra.mxu1 %v2919_v9 }
  0x31   : > { %2378 = vmatprep.subr.bf16.mxu1 %v3575_v0  ;;  %2391 = vmatmul.mubr.msk.bf16.vlgmr.msra.gmra.mrb[4].mxu0 %vm724_vm2, %v2962_v20 }
  0x32   : > { %2396 = vmatprep.mubr.msk.bf16.mxu0 %vm2753_vm0, %v3575_v0 }
  0x34   : > { %2379 = vmatpush3.bf16.msra.mxu1 %v2929_v10 }
  0x35   : > { %2380 = vmatprep.subr.bf16.mxu1 %v3575_v0 }
  0x38   : > { %2381 = vmatpush3.bf16.msra.mxu1 %v2936_v11 }
  0x39   : > { %2382 = vmatprep.subr.bf16.mxu1 %v3575_v0 }
  0x3c   : > { %2383 = vmatpush3.bf16.msra.mxu1 %v2945_v12 }
  0x3d   : > { %2400 = vmatprep.subr.bf16.mxu1 %v3575_v0 }
  0xfc   : > { %v766_v14 = vpop.f32.mrb[0].mxu0 }
  0xfd   : > { %v772_v15 = vadd.f32 %v766_v14, %v2953_v13  ;;  %v2366_v16 = vpop.f32.mrb[1].mxu0  ;;  %v3163_v14 = vld [vmem:[%s539_s15] sm:$0xff]  ;;  %s554_s15 = scalar_lea.vmem %s3570_s12, %s2875_s20 }
  0xfe   : > { %v769_v17 = vpop.f32.mrb[2].mxu0  ;;  %3604 = vst [vmem:[#allocation6_spill] sm:$0xff] %v3163_v14 }
  0xff   : > { %v773_v18 = vpack.c.bf16 %v772_v15, %v772_v15  ;;  %v2367_v19 = vpop.f32.mrb[3].mxu0 }
 0x100   : > { %v3169_v19 = vld [vmem:[%s3566_s8] ss:$12 sps:$4 sm:$0xff]  }
 0x101   : > { %2385 = vmatmul.mubr.bf16.vlgmr.msra.gmra.mrb[0].mxu1 %v773_v18  ;;  %3605 = vst [vmem:[#allocation7_spill] sm:$0xff] %v3169_v19 }
 0x102   : > { %2416 = vmatprep.mubr.msk.bf16.mxu1 %vm2753_vm0, %v3575_v0  ;;  %2401 = vmatpush3.bf16.msra.mxu1 %v2971_v21 }
 0x103   : > { %2402 = vmatprep.subr.bf16.mxu1 %v3575_v0 }
 0x106   : > { %2403 = vmatpush3.bf16.msra.mxu1 %v2978_v22 }
 0x107   : > { %2404 = vmatprep.subr.bf16.mxu1 %v3575_v0 }
 0x10a   : > { %2405 = vmatpush3.bf16.msra.mxu1 %v2985_v23 }
 0x10b   : > { %2406 = vmatprep.subr.bf16.mxu1 %v3575_v0 }
 0x10e   : > { %2407 = vmatpush3.bf16.msra.mxu1 %v2992_v24 }
 0x10f   : > { %2408 = vmatprep.subr.bf16.mxu1 %v3575_v0 }
 0x112   : > { %2409 = vmatpush3.bf16.msra.mxu1 %v2999_v25 }
 0x113   : > { %2410 = vmatprep.subr.bf16.mxu1 %v3575_v0 }
 0x116   : > { %2411 = vmatpush3.bf16.msra.mxu1 %v3006_v26 }
 0x117   : > { %2412 = vmatprep.subr.bf16.mxu1 %v3575_v0 }
 0x11a   : > { %2413 = vmatpush3.bf16.msra.mxu1 %v3013_v27 }
 0x11b   : > { %2414 = vmatprep.subr.bf16.mxu1 %v3575_v0 }
 0x11e   : > { %2415 = vmatpush3.bf16.msra.mxu1 %v3147_v62 }
 0x11f   : > { %2420 = vmatprep.subr.bf16.mxu1 %v3575_v0 }
 0x1d4   : > { %v856_v29 = vpop.f32.mrb[0].mxu1 }
 0x1d5   : > { %v857_v30 = vadd.f32 %v856_v29, %v3022_v28  ;;  %v2386_v31 = vpop.f32.mrb[1].mxu1  ;;  %v3174_v29 = vld [vmem:[%s3566_s8 + $0x8] ss:$12 sps:$4 sm:$0xff]  }
 0x1d6   : > { %v859_v33 = vpop.f32.mrb[2].mxu1  ;;  %3606 = vst [vmem:[#allocation8_spill] sm:$0xff] %v3174_v29 }
 0x1d7   : > { %v863_v34 = vmin.f32 %v857_v30, 0.0  ;;  %v2387_v35 = vpop.f32.mrb[3].mxu1  ;;  %v862_v36 = vmax.f32 %v857_v30, 0.0  ;;  %v3179_v33 = vld [vmem:[%s3566_s8 + $0x1c] ss:$12 sps:$4 sm:$0xff]  }
 0x1d8   : > { %3607 = vst [vmem:[#allocation9_spill] sm:$0xff] %v3179_v33  ;;  %v3191_v35 = vld [vmem:[%s3566_s8 + $0x20] ss:$12 sps:$4 sm:$0xff]  }
 0x1d9   : > { %v865_v37 = vmul.f32 %v3574_v32, %v863_v34  ;;  %v3185_v34 = vld [vmem:[%s3566_s8 + $0x18] ss:$12 sps:$4 sm:$0xff]   ;;  %3609 = vst [vmem:[#allocation11_spill] sm:$0xff] %v3191_v35 }
 0x1da   : > { %3608 = vst [vmem:[#allocation10_spill] sm:$0xff] %v3185_v34  ;;  %v3289_v32 = vld [vmem:[%s3566_s8 + $0x98] ss:$12 sps:$4 sm:$0xff]  }
 0x1db   : > { %v866_v39 = vadd.f32 %v865_v37, %v862_v36  ;;  %v3197_v36 = vld [vmem:[%s3566_s8 + $0x34] ss:$12 sps:$4 sm:$0xff]   ;;  %v3207_v37 = vld [vmem:[%s3566_s8 + $0x30] ss:$12 sps:$4 sm:$0xff]   ;;  %3624 = vst [vmem:[#allocation26_spill] sm:$0xff] %v3289_v32 }
 0x1dc   : > { %3610 = vst [vmem:[#allocation12_spill] sm:$0xff] %v3197_v36  ;;  %3611 = vst [vmem:[#allocation13_spill] sm:$0xff] %v3207_v37 }
 0x1dd   : > { %v867_v41 = vmul.f32 %v866_v39, %v3031_v38  ;;  %v3213_v39 = vld [vmem:[%s3566_s8 + $0x38] ss:$12 sps:$4 sm:$0xff]  }
 0x1de   : > { %3612 = vst [vmem:[#allocation14_spill] sm:$0xff] %v3213_v39 }
 0x1df   : > { %v868_v42 = vadd.f32 %v867_v41, %v3036_v40  ;;  %v3219_v41 = vld [vmem:[%s3566_s8 + $0x4c] ss:$12 sps:$4 sm:$0xff]  }
 0x1e0   : > { %3613 = vst [vmem:[#allocation15_spill] sm:$0xff] %v3219_v41 }
 0x1e1   : > { %v913_v43 = vpack.c.bf16 %v868_v42, %v868_v42  ;;  %v3226_v42 = vld [vmem:[%s3566_s8 + $0x48] ss:$12 sps:$4 sm:$0xff]  }
 0x1e2   : > { %3614 = vst [vmem:[#allocation16_spill] sm:$0xff] %v3226_v42 }
 0x1e3   : > { %v918_v45 = vsel %vm728_vm1, %v913_v43, 0  ;;  %v3232_v43 = vld [vmem:[%s3566_s8 + $0x50] ss:$12 sps:$4 sm:$0xff]  }
 0x1e4   : > { %2395 = vmatpush3.bf16.msra.mxu0 %v918_v45  ;;  %3615 = vst [vmem:[#allocation17_spill] sm:$0xff] %v3232_v43  ;;  %v3238_v45 = vld [vmem:[%s3566_s8 + $0x64] ss:$12 sps:$4 sm:$0xff]  }
 0x1e5   : > { %1090 = vmatprep.subr.bf16.mxu0 %v3047_v44  ;;  %3616 = vst [vmem:[#allocation18_spill] sm:$0xff] %v3238_v45 }
 0x1e7   : > { %2397 = vmatmul.mubr.msk.bf16.vlgmr.msra.gmra.mrb[4].mxu0 %vm724_vm2, %v3050_v46 }
 0x1e8   : > { %1091 = vmatpush1.bf16.msra.mxu0 %v3055_v47  ;;  %1122 = vmatprep.mubr.bf16.mxu0 %v3572_v6 }
 0x1e9   : > { %1092 = vmatprep.subr.bf16.mxu0 %v3061_v48 }
 0x1ec   : > { %1093 = vmatpush1.bf16.msra.mxu0 %v3069_v49 }
 0x1ed   : > { %1094 = vmatprep.subr.bf16.mxu0 %v3075_v50 }
 0x1f0   : > { %1095 = vmatpush1.bf16.msra.mxu0 %v3081_v51 }
 0x1f1   : > { %1096 = vmatprep.subr.bf16.mxu0 %v3087_v52 }
 0x1f4   : > { %1097 = vmatpush1.bf16.msra.mxu0 %v3093_v53 }
 0x1f5   : > { %1098 = vmatprep.subr.bf16.mxu0 %v3099_v54 }
 0x1f8   : > { %1099 = vmatpush1.bf16.msra.mxu0 %v3105_v55 }
 0x1f9   : > { %1100 = vmatprep.subr.bf16.mxu0 %v3111_v56 }
 0x1fc   : > { %1101 = vmatpush1.bf16.msra.mxu0 %v3117_v57 }
 0x1fd   : > { %1102 = vmatprep.subr.bf16.mxu0 %v3123_v58 }
 0x200   : > { %1103 = vmatpush1.bf16.msra.mxu0 %v3129_v59 }
 0x201   : > { %1104 = vmatprep.subr.bf16.mxu0 %v3136_v60 }
 0x204   : > { %1105 = vmatpush1.bf16.msra.mxu0 %v3141_v61 }
 0x205   : > { %1299 = vmatprep.subr.bf16.mxu0 %v3154_v63 }
 0x2ba   : > { %v954_v15 = vpop.f32.mrb[4].mxu0 }
 0x2bb   : > { %v2564_v16 = vadd.f32 %v954_v15, %v3163_v14  ;;  %v2398_v17 = vpop.f32.mrb[5].mxu0  ;;  %v3245_v15 = vld [vmem:[%s3566_s8 + $0x60] ss:$12 sps:$4 sm:$0xff]  }
 0x2bc   : > { %v957_v18 = vpop.f32.mrb[6].mxu0  ;;  %3617 = vst [vmem:[#allocation19_spill] sm:$0xff] %v3245_v15  ;;  %v3257_v17 = vld [vmem:[%s3566_s8 + $0x7c] ss:$12 sps:$4 sm:$0xff]  }
 0x2bd   : > { %v961_v30 = vpack.c.bf16 %v2564_v16, %v2564_v16  ;;  %v2399_v31 = vpop.f32.mrb[7].mxu0  ;;  %v3251_v16 = vld [vmem:[%s3566_s8 + $0x68] ss:$12 sps:$4 sm:$0xff]   ;;  %3619 = vst [vmem:[#allocation21_spill] sm:$0xff] %v3257_v17  ;;  %v3264_v18 = vld [vmem:[%s3566_s8 + $0x78] ss:$12 sps:$4 sm:$0xff]  }
 0x2be   : > { %3618 = vst [vmem:[#allocation20_spill] sm:$0xff] %v3251_v16  ;;  %3620 = vst [vmem:[#allocation22_spill] sm:$0xff] %v3264_v18  ;;  %v3276_v31 = vld [vmem:[%s3566_s8 + $0x94] ss:$12 sps:$4 sm:$0xff]  }
 0x2bf   : > { %1123 = vmatmul.mubr.bf16.vlgmr.msra.gmra.mrb[8].mxu0 %v961_v30  ;;  %2417 = vmatmul.mubr.bf16.vlgmr.msra.gmra.mrb[4].mxu1 %v961_v30  ;;  %v3270_v30 = vld [vmem:[%s3566_s8 + $0x80] ss:$12 sps:$4 sm:$0xff]   ;;  %3622 = vst [vmem:[#allocation24_spill] sm:$0xff] %v3276_v31 }
 0x2c0   : > { %1300 = vmatpush1.bf16.msra.mxu0 %v3169_v19  ;;  %2421 = vmatpush3.bf16.msra.mxu1 %v3174_v29  ;;  %3621 = vst [vmem:[#allocation23_spill] sm:$0xff] %v3270_v30 }
 0x2c1   : > { %1301 = vmatprep.subr.bf16.mxu0 %v3179_v33  ;;  %2422 = vmatprep.subr.bf16.mxu1 %v3575_v0 }
 0x2c2   : > { %1331 = vmatprep.mubr.bf16.mxu0 %v3572_v6  ;;  %2436 = vmatprep.mubr.msk.bf16.mxu1 %vm2753_vm0, %v3575_v0  ;;  %v3283_v6 = vld [vmem:[%s3566_s8 + $0x90] ss:$12 sps:$4 sm:$0xff]  }
 0x2c3   : > { %3623 = vst [vmem:[#allocation25_spill] sm:$0xff] %v3283_v6 }
 0x2c4   : > { %1302 = vmatpush1.bf16.msra.mxu0 %v3185_v34  ;;  %2423 = vmatpush3.bf16.msra.mxu1 %v3191_v35 }
 0x2c5   : > { %1303 = vmatprep.subr.bf16.mxu0 %v3197_v36  ;;  %2424 = vmatprep.subr.bf16.mxu1 %v3575_v0 }
 0x2c8   : > { %1304 = vmatpush1.bf16.msra.mxu0 %v3207_v37  ;;  %2425 = vmatpush3.bf16.msra.mxu1 %v3213_v39 }
 0x2c9   : > { %1305 = vmatprep.subr.bf16.mxu0 %v3219_v41  ;;  %2426 = vmatprep.subr.bf16.mxu1 %v3575_v0 }
 0x2cc   : > { %1306 = vmatpush1.bf16.msra.mxu0 %v3226_v42  ;;  %2427 = vmatpush3.bf16.msra.mxu1 %v3232_v43 }
 0x2cd   : > { %1307 = vmatprep.subr.bf16.mxu0 %v3238_v45  ;;  %2428 = vmatprep.subr.bf16.mxu1 %v3575_v0 }
 0x2d0   : > { %1308 = vmatpush1.bf16.msra.mxu0 %v3245_v15  ;;  %2429 = vmatpush3.bf16.msra.mxu1 %v3251_v16  ;;  %v2187_v15 = vld [vmem:[%s3568_s10 + $0x2] ss:$8 sm:$0x7] }
 0x2d1   : > { %1309 = vmatprep.subr.bf16.mxu0 %v3257_v17  ;;  %2430 = vmatprep.subr.bf16.mxu1 %v3575_v0  ;;  %v3295_v0 = vld [vmem:[%s3566_s8 + $0xac] ss:$12 sps:$4 sm:$0xff]   ;;  %v684_v17 = vlaneseq }
 0x2d2   : > { %3625 = vst [vmem:[#allocation27_spill] sm:$0xff] %v3295_v0 }
 0x2d4   : > { %1310 = vmatpush1.bf16.msra.mxu0 %v3264_v18  ;;  %2431 = vmatpush3.bf16.msra.mxu1 %v3270_v30  ;;  %v3626_v18 = vmov 0.0   ;;  %v3302_v30 = vld [vmem:[%s3566_s8 + $0xa8] ss:$12 sps:$4 sm:$0xff]  }
 0x2d5   : > { %1311 = vmatprep.subr.bf16.mxu0 %v3276_v31  ;;  %2432 = vmatprep.subr.bf16.mxu1 %v3626_v18  ;;  %3627 = vst [vmem:[#allocation28_spill] sm:$0xff] %v3302_v30  ;;  %v3308_v31 = vld [vmem:[%s3566_s8 + $0xb0] ss:$12 sps:$4 sm:$0xff]  }
 0x2d6   : > { %3628 = vst [vmem:[#allocation29_spill] sm:$0xff] %v3308_v31 }
 0x2d8   : > { %1312 = vmatpush1.bf16.msra.mxu0 %v3283_v6  ;;  %2433 = vmatpush3.bf16.msra.mxu1 %v3289_v32 }
 0x2d9   : > { %1313 = vmatprep.subr.bf16.mxu0 %v3295_v0  ;;  %2434 = vmatprep.subr.bf16.mxu1 %v3626_v18 }
 0x2dc   : > { %1314 = vmatpush1.bf16.msra.mxu0 %v3302_v30  ;;  %2435 = vmatpush3.bf16.msra.mxu1 %v3308_v31  ;;  %v685_v31 = vshrl.u32 %v684_v17, 7 }
 0x2dd   : > { %2440 = vmatprep.subr.bf16.mxu0 %v3626_v18  ;;  %2466 = vmatprep.subr.bf16.mxu1 %v3626_v18 }
 0x2de   : > { %v686_v16 = vsub.s32 0, %v685_v31  ;;  %v690_v45 = vsub.s32 1, %v685_v31 }
 0x2df   : > { %1332 = vmatmul.mubr.bf16.vlgmr.msra.gmra.mrb[8].mxu0 %v2893_v4  ;;  %2437 = vmatmul.mubr.bf16.vlgmr.msra.gmra.mrb[8].mxu1 %v2893_v4  ;;  %v2186_v4 = vld [vmem:[%s3568_s10 + $0x1] ss:$8 sm:$0x7] }
 0x2e0   : > { %2442 = vmatprep.mubr.msk.bf16.mxu0 %vm2753_vm0, %v3626_v18  ;;  %2468 = vmatprep.mubr.msk.bf16.mxu1 %vm2753_vm0, %v3626_v18  ;;  %v687_v43 = vrot.slane %v2186_v4, %v686_v16  ;;  %v705_v42 = vrot.slane %v2187_v15, %v686_v16  ;;  %v691_v41 = vrot.slane %v2186_v4, %v690_v45 }
 0x2e1   : > { %v709_v39 = vrot.slane %v2187_v15, %v690_v45 }
 0x2e2   : > { %v3328_v37 = vadd.f32 %v705_v42, %v687_v43 }
 0x392   : > { %v1165_v0 = vpop.f32.mrb[4].mxu1 }
 0x393   : > { %v2418_v32 = vpop.f32.mrb[5].mxu1 }
 0x394   : > { %v1168_v6 = vpop.f32.mrb[6].mxu1 }
 0x395   : > { %v2419_v30 = vpop.f32.mrb[7].mxu1  ;;  %v3330_v6 = vadd.f32 %v709_v39, %v691_v41  ;;  %v694_v39 = vsub.s32 2, %v685_v31 }
 0x397   : > { %v3334_v41 = vrot.slane %v2187_v15, %v694_v39 }
 0x3b2   : > { %v1333_v32 = vpop.f32.mrb[8].mxu0  ;;  %v1374_v17 = vpop.f32.mrb[8].mxu1 }
 0x3b3   : > { %v2566_v30 = vadd.f32 %v3328_v37, %v1333_v32  ;;  %v1335_v36 = vpop.f32.mrb[9].mxu0  ;;  %v2438_v35 = vpop.f32.mrb[9].mxu1  ;;  %v3336_v32 = vrot.slane %v2186_v4, %v694_v39  ;;  %v3647_v39 = vld [vmem:[#allocation21_spill] sm:$0xff] }
 0x3b4   : > { %v1337_v34 = vpop.f32.mrb[10].mxu0  ;;  %v1377_v33 = vpop.f32.mrb[10].mxu1  ;;  %v2568_v63 = vadd.f32 %v3330_v6, %v1335_v36 }
 0x3b5   : > { %v2249_v29 = vmul.f32 -1.442695, %v2566_v30  ;;  %v1338_v19 = vpop.f32.mrb[11].mxu0  ;;  %v2439_v14 = vpop.f32.mrb[11].mxu1  ;;  %v1375_v33 = vadd.f32 %v1374_v17, %v3334_v41 }
 0x3b6   : > { %v2250_v16 = vmul.f32 -1.442695, %v2568_v63  ;;  %v1166_v14 = vadd.f32 %v1165_v0, %v3336_v32 }
 0x3b7   : > { %2700 = vpow2.f32 %v2249_v29 }
 0x3b8   : > { %2702 = vpow2.f32 %v2250_v16 }
 0x3c1   : > { %v2701_v42 = vpop.eup %2700 }
 0x3c2   : > { %v1384_v43 = vadd.f32 1.0, %v2701_v42  ;;  %v2703_v45 = vpop.eup %2702  ;;  %v3645_v42 = vld [vmem:[#allocation19_spill] sm:$0xff] }
 0x3c3   : > { %v1391_v35 = vadd.f32 1.0, %v2703_v45  ;;  %v3648_v45 = vld [vmem:[#allocation22_spill] sm:$0xff] }
 0x3c4   : > { %2704 = vrcp.f32 %v1384_v43  ;;  %v3646_v43 = vld [vmem:[#allocation20_spill] sm:$0xff] }
 0x3c5   : > { %2706 = vrcp.f32 %v1391_v35  ;;  %v3649_v35 = vld [vmem:[#allocation23_spill] sm:$0xff] }
 0x3ce   : > { %v2705_v34 = vpop.eup %2704 }
 0x3cf   : > { %v1394_v19 = vmul.f32 %v2705_v34, %v1375_v33  ;;  %v2707_v63 = vpop.eup %2706  ;;  %v3650_v33 = vld [vmem:[#allocation24_spill] sm:$0xff]  ;;  %v3651_v34 = vld [vmem:[#allocation25_spill] sm:$0xff] }
 0x3d0   : > { %v1397_v36 = vsub.f32 1.0, %v2707_v63  ;;  %v1399_v15 = vmul.f32 %v2707_v63, %v2885_v3  ;;  %v3655_v63 = vld [vmem:[#allocation29_spill] sm:$0xff] }
 0x3d1   : > { %v1395_v29 = vadd.f32 %v1394_v19, %v1166_v14  ;;  %v3652_v14 = vld [vmem:[#allocation26_spill] sm:$0xff]  ;;  %v3653_v19 = vld [vmem:[#allocation27_spill] sm:$0xff] }
 0x3d3   : > { %2708 = vtanh.f32 %v1395_v29  ;;  %v3654_v29 = vld [vmem:[#allocation28_spill] sm:$0xff] }
 0x3dd   : > { %v2709_v30 = vpop.eup %2708 }
 0x3de   : > { %v1398_v16 = vmul.f32 %v2709_v30, %v1397_v36 }
 0x3e0   : > { %v3341_v31 = vadd.f32 %v1399_v15, %v1398_v16 }
 0x3e2   : > { %v3345_v4 = vpack.c.bf16 %v3341_v31, %v3341_v31 }
 0x3e4   : > { %v1403_v17 = vsel %vm728_vm1, %v3345_v4, 0 }
 0x3e5   : > { %2441 = vmatpush3.bf16.msra.mxu0 %v1403_v17  ;;  %2467 = vmatpush3.bf16.msra.mxu1 %v1403_v17 }
 0x3e6   : > { %2446 = vmatprep.subr.bf16.mxu0 %v3626_v18  ;;  %2472 = vmatprep.subr.bf16.mxu1 %v3626_v18 }
 0x3e8   : > { %2443 = vmatmul.mubr.msk.bf16.vlgmr.msra.gmra.mrb[12].mxu0 %vm724_vm2, %v2904_v7  ;;  %2469 = vmatmul.mubr.msk.bf16.vlgmr.msra.gmra.mrb[12].mxu1 %vm724_vm2, %v2962_v20 }
 0x3e9   : > { %2447 = vmatpush3.bf16.msra.mxu0 %v2860_v1  ;;  %2462 = vmatprep.mubr.msk.bf16.mxu0 %vm2753_vm0, %v3626_v18 }
 0x3ea   : > { %2448 = vmatprep.subr.bf16.mxu0 %v3626_v18  ;;  %2474 = vmatprep.mubr.msk.bf16.mxu1 %vm2753_vm0, %v3626_v18 }
 0x3ed   : > { %2449 = vmatpush3.bf16.msra.mxu0 %v2872_v2 }
 0x3ee   : > { %2450 = vmatprep.subr.bf16.mxu0 %v3626_v18 }
 0x3f1   : > { %2451 = vmatpush3.bf16.msra.mxu0 %v2899_v5 }
 0x3f2   : > { %2452 = vmatprep.subr.bf16.mxu0 %v3626_v18 }
 0x3f5   : > { %2453 = vmatpush3.bf16.msra.mxu0 %v2909_v8 }
 0x3f6   : > { %2454 = vmatprep.subr.bf16.mxu0 %v3626_v18 }
 0x3f9   : > { %2455 = vmatpush3.bf16.msra.mxu0 %v2919_v9 }
 0x3fa   : > { %2456 = vmatprep.subr.bf16.mxu0 %v3626_v18 }
 0x3fd   : > { %2457 = vmatpush3.bf16.msra.mxu0 %v2929_v10 }
 0x3fe   : > { %2458 = vmatprep.subr.bf16.mxu0 %v3626_v18 }
 0x401   : > { %2459 = vmatpush3.bf16.msra.mxu0 %v2936_v11 }
 0x402   : > { %2460 = vmatprep.subr.bf16.mxu0 %v3626_v18 }
 0x405   : > { %2461 = vmatpush3.bf16.msra.mxu0 %v2945_v12 }
 0x406   : > { %2478 = vmatprep.subr.bf16.mxu0 %v3626_v18 }
 0x4bb   : > { %v1439_v0 = vpop.f32.mrb[12].mxu0 }
 0x4bc   : > { %v1445_v1 = vadd.f32 %v1439_v0, %v2953_v13  ;;  %v2444_v2 = vpop.f32.mrb[13].mxu0 }
 0x4bd   : > { %v1442_v3 = vpop.f32.mrb[14].mxu0 }
 0x4be   : > { %v1446_v5 = vpack.c.bf16 %v1445_v1, %v1445_v1  ;;  %v2445_v7 = vpop.f32.mrb[15].mxu0 }
 0x4c0   : > { %2463 = vmatmul.mubr.bf16.vlgmr.msra.gmra.mrb[16].mxu0 %v1446_v5 }
 0x4c1   : > { %2479 = vmatpush3.bf16.msra.mxu0 %v2971_v21  ;;  %2494 = vmatprep.mubr.msk.bf16.mxu0 %vm2753_vm0, %v3626_v18  ;;  %v3629_v21 = vstv %s3017_s19 }
 0x4c2   : > { %2480 = vmatprep.subr.bf16.mxu0 %v3626_v18 }
 0x4c5   : > { %2481 = vmatpush3.bf16.msra.mxu0 %v2978_v22 }
 0x4c6   : > { %2482 = vmatprep.subr.bf16.mxu0 %v3626_v18 }
 0x4c9   : > { %2483 = vmatpush3.bf16.msra.mxu0 %v2985_v23 }
 0x4ca   : > { %2484 = vmatprep.subr.bf16.mxu0 %v3626_v18 }
 0x4cd   : > { %2485 = vmatpush3.bf16.msra.mxu0 %v2992_v24 }
 0x4ce   : > { %2486 = vmatprep.subr.bf16.mxu0 %v3626_v18 }
 0x4d1   : > { %2487 = vmatpush3.bf16.msra.mxu0 %v2999_v25 }
 0x4d2   : > { %2488 = vmatprep.subr.bf16.mxu0 %v3626_v18 }
 0x4d5   : > { %2489 = vmatpush3.bf16.msra.mxu0 %v3006_v26 }
 0x4d6   : > { %2490 = vmatprep.subr.bf16.mxu0 %v3626_v18 }
 0x4d9   : > { %2491 = vmatpush3.bf16.msra.mxu0 %v3013_v27 }
 0x4da   : > { %2492 = vmatprep.subr.bf16.mxu0 %v3626_v18 }
 0x4dd   : > { %2493 = vmatpush3.bf16.msra.mxu0 %v3147_v62  ;;  %v3644_v62 = vld [vmem:[#allocation18_spill] sm:$0xff] }
 0x4de   : > { %2498 = vmatprep.subr.bf16.mxu0 %v3626_v18 }
 0x593   : > { %v1481_v8 = vpop.f32.mrb[16].mxu0 }
 0x594   : > { %v1482_v9 = vadd.f32 %v1481_v8, %v3022_v28  ;;  %v2464_v10 = vpop.f32.mrb[17].mxu0  ;;  %v3630_v28 = vmov 0  }
 0x595   : > { %v1484_v11 = vpop.f32.mrb[18].mxu0 }
 0x596   : > { %v1488_v12 = vmin.f32 %v1482_v9, 0.0  ;;  %v2465_v13 = vpop.f32.mrb[19].mxu0  ;;  %v1487_v20 = vmax.f32 %v1482_v9, 0.0 }
 0x598   : > { %v1489_v22 = vmul.f32 %v1488_v12, %v3629_v21 }
 0x59a   : > { %v1490_v23 = vadd.f32 %v1489_v22, %v1487_v20 }
 0x59c   : > { %v1491_v24 = vmul.f32 %v1490_v23, %v3031_v38  ;;  %v3631_v38 = vld [vmem:[#allocation5_spill] sm:$0xff] }
 0x59e   : > { %v1492_v25 = vadd.f32 %v1491_v24, %v3036_v40 }
 0x5a0   : > { %v1534_v26 = vpack.c.bf16 %v1492_v25, %v1492_v25 }
 0x5a2   : > { %v1536_v27 = vsel %vm728_vm1, %v1534_v26, 0 }
 0x5a3   : > { %2473 = vmatpush3.bf16.msra.mxu1 %v1536_v27 }
 0x5a4   : > { %1580 = vmatprep.subr.bf16.mxu1 %v3047_v44  ;;  %v3632_v44 = vld [vmem:[#allocation6_spill] sm:$0xff] }
 0x5a6   : > { %2475 = vmatmul.mubr.msk.bf16.vlgmr.msra.gmra.mrb[12].mxu1 %vm724_vm2, %v3050_v46 }
 0x5a7   : > { %1581 = vmatpush1.bf16.msra.mxu1 %v3055_v47  ;;  %1612 = vmatprep.mubr.bf16.mxu1 %v3630_v28 }
 0x5a8   : > { %1582 = vmatprep.subr.bf16.mxu1 %v3061_v48 }
 0x5ab   : > { %1583 = vmatpush1.bf16.msra.mxu1 %v3069_v49 }
 0x5ac   : > { %1584 = vmatprep.subr.bf16.mxu1 %v3075_v50 }
 0x5af   : > { %1585 = vmatpush1.bf16.msra.mxu1 %v3081_v51  ;;  %v3633_v51 = vld [vmem:[#allocation7_spill] sm:$0xff] }
 0x5b0   : > { %1586 = vmatprep.subr.bf16.mxu1 %v3087_v52  ;;  %v3634_v52 = vld [vmem:[#allocation8_spill] sm:$0xff] }
 0x5b3   : > { %1587 = vmatpush1.bf16.msra.mxu1 %v3093_v53  ;;  %v3635_v53 = vld [vmem:[#allocation9_spill] sm:$0xff] }
 0x5b4   : > { %1588 = vmatprep.subr.bf16.mxu1 %v3099_v54  ;;  %v3636_v54 = vld [vmem:[#allocation10_spill] sm:$0xff] }
 0x5b7   : > { %1589 = vmatpush1.bf16.msra.mxu1 %v3105_v55  ;;  %v3637_v55 = vld [vmem:[#allocation11_spill] sm:$0xff] }
 0x5b8   : > { %1590 = vmatprep.subr.bf16.mxu1 %v3111_v56  ;;  %v3638_v56 = vld [vmem:[#allocation12_spill] sm:$0xff] }
 0x5bb   : > { %1591 = vmatpush1.bf16.msra.mxu1 %v3117_v57  ;;  %v3639_v57 = vld [vmem:[#allocation13_spill] sm:$0xff] }
 0x5bc   : > { %1592 = vmatprep.subr.bf16.mxu1 %v3123_v58  ;;  %v3640_v58 = vld [vmem:[#allocation14_spill] sm:$0xff] }
 0x5bf   : > { %1593 = vmatpush1.bf16.msra.mxu1 %v3129_v59  ;;  %v3641_v59 = vld [vmem:[#allocation15_spill] sm:$0xff] }
 0x5c0   : > { %1594 = vmatprep.subr.bf16.mxu1 %v3136_v60  ;;  %v3642_v60 = vld [vmem:[#allocation16_spill] sm:$0xff] }
 0x5c3   : > { %1595 = vmatpush1.bf16.msra.mxu1 %v3141_v61  ;;  %v3643_v61 = vld [vmem:[#allocation17_spill] sm:$0xff] }
 0x5c4   : > { %1661 = vmatprep.subr.bf16.mxu1 %v3631_v38 }
 0x679   : > { %v1572_v40 = vpop.f32.mrb[12].mxu1 }
 0x67a   : > { %v2569_v46 = vadd.f32 %v1572_v40, %v3632_v44  ;;  %v2476_v47 = vpop.f32.mrb[13].mxu1  ;;  %v565_v44 = vld [vmem:[%s550_s18] sm:$0x1] }
 0x67b   : > { %v1575_v48 = vpop.f32.mrb[14].mxu1  ;;  %v2686_v47 = vld [vmem:[%s3567_s9 + $0x34] ss:$12 sps:$4 sm:$0xff]  }
 0x67c   : > { %v1579_v49 = vpack.c.bf16 %v2569_v46, %v2569_v46  ;;  %v2477_v50 = vpop.f32.mrb[15].mxu1  ;;  %v2684_v46 = vld [vmem:[%s3567_s9 + $0x4] ss:$12 sps:$4 sm:$0xff]   ;;  %v2687_v48 = vld [vmem:[%s3567_s9 + $0x4c] ss:$12 sps:$4 sm:$0xff]  }
 0x67d   : > { %v2689_v50 = vld [vmem:[%s3567_s9 + $0x7c] ss:$12 sps:$4 sm:$0xff]  }
 0x67e   : > { %1613 = vmatmul.mubr.bf16.vlgmr.msra.gmra.mrb[16].mxu1 %v1579_v49  ;;  %2495 = vmatmul.mubr.bf16.vlgmr.msra.gmra.mrb[20].mxu0 %v1579_v49  ;;  %v2688_v49 = vld [vmem:[%s3567_s9 + $0x64] ss:$12 sps:$4 sm:$0xff]  }
 0x67f   : > { %1662 = vmatpush1.bf16.msra.mxu1 %v3633_v51  ;;  %2499 = vmatpush3.bf16.msra.mxu0 %v3634_v52  ;;  %v2690_v51 = vld [vmem:[%s3567_s9 + $0x94] ss:$12 sps:$4 sm:$0xff]   ;;  %v2691_v52 = vld [vmem:[%s3567_s9 + $0xac] ss:$12 sps:$4 sm:$0xff]  }
 0x680   : > { %1663 = vmatprep.subr.bf16.mxu1 %v3635_v53  ;;  %2500 = vmatprep.subr.bf16.mxu0 %v3626_v18 }
 0x681   : > { %1693 = vmatprep.mubr.bf16.mxu1 %v3630_v28  ;;  %2514 = vmatprep.mubr.msk.bf16.mxu0 %vm2753_vm0, %v3626_v18 }
 0x683   : > { %1664 = vmatpush1.bf16.msra.mxu1 %v3636_v54  ;;  %2501 = vmatpush3.bf16.msra.mxu0 %v3637_v55 }
 0x684   : > { %1665 = vmatprep.subr.bf16.mxu1 %v3638_v56  ;;  %2502 = vmatprep.subr.bf16.mxu0 %v3626_v18 }
 0x687   : > { %1666 = vmatpush1.bf16.msra.mxu1 %v3639_v57  ;;  %2503 = vmatpush3.bf16.msra.mxu0 %v3640_v58 }
 0x688   : > { %1667 = vmatprep.subr.bf16.mxu1 %v3641_v59  ;;  %2504 = vmatprep.subr.bf16.mxu0 %v3626_v18  ;;  %v717_v59 = vld [vmem:[%s3568_s10 + $0x3] ss:$0 sm:$0xff] }
 0x68b   : > { %1668 = vmatpush1.bf16.msra.mxu1 %v3642_v60  ;;  %2505 = vmatpush3.bf16.msra.mxu0 %v3643_v61 }
 0x68c   : > { %1669 = vmatprep.subr.bf16.mxu1 %v3644_v62  ;;  %2506 = vmatprep.subr.bf16.mxu0 %v3626_v18 }
 0x68f   : > { %1670 = vmatpush1.bf16.msra.mxu1 %v3645_v42  ;;  %2507 = vmatpush3.bf16.msra.mxu0 %v3646_v43  ;;  %v1905_v42 = vstv %s2188_s23 }
 0x690   : > { %1671 = vmatprep.subr.bf16.mxu1 %v3647_v39  ;;  %2508 = vmatprep.subr.bf16.mxu0 %v3626_v18 }
 0x693   : > { %1672 = vmatpush1.bf16.msra.mxu1 %v3648_v45  ;;  %2509 = vmatpush3.bf16.msra.mxu0 %v3649_v35 }
 0x694   : > { %1673 = vmatprep.subr.bf16.mxu1 %v3650_v33  ;;  %2510 = vmatprep.subr.bf16.mxu0 %v3626_v18 }
 0x697   : > { %1674 = vmatpush1.bf16.msra.mxu1 %v3651_v34  ;;  %2511 = vmatpush3.bf16.msra.mxu0 %v3652_v14  ;;  %v718_v34 = vld [vmem:[%s3568_s10 + $0x4] ss:$0 sm:$0xff] }
 0x698   : > { %1675 = vmatprep.subr.bf16.mxu1 %v3653_v19  ;;  %2512 = vmatprep.subr.bf16.mxu0 %v3626_v18 }
 0x69b   : > { %1676 = vmatpush1.bf16.msra.mxu1 %v3654_v29  ;;  %2513 = vmatpush3.bf16.msra.mxu0 %v3655_v63  ;;  %v2692_v63 = vld [vmem:[%s3567_s9 + $0x8] ss:$12 sps:$4 sm:$0xff]  }
 0x69c   : > { %2518 = vmatprep.subr.bf16.mxu1 %v3626_v18  ;;  %2544 = vmatprep.subr.bf16.mxu0 %v3626_v18 }
 0x69e   : > { %1694 = vmatmul.mubr.bf16.vlgmr.msra.gmra.mrb[16].mxu1 %v3345_v4  ;;  %2515 = vmatmul.mubr.bf16.vlgmr.msra.gmra.mrb[24].mxu0 %v3345_v4 }
 0x69f   : > { %2520 = vmatprep.mubr.msk.bf16.mxu1 %vm2753_vm0, %v3626_v18  ;;  %2560 = vmatprep.mubr.msk.bf16.mxu0 %vm2753_vm0, %v3626_v18 }
 0x6a0   : > { %2545 = vmatpush3.bf16.msra.mxu0 %v2692_v63 }
 0x6a1   : > { %2546 = vmatprep.subr.bf16.mxu0 %v3626_v18 }
 0x751   : > { %v1655_v36 = vpop.f32.mrb[20].mxu0 }
 0x752   : > { %v2496_v30 = vpop.f32.mrb[21].mxu0  ;;  %v1656_v23 = vadd.f32 %v1655_v36, %v3336_v32  ;;  %v2693_v36 = vld [vmem:[%s3567_s9 + $0x20] ss:$12 sps:$4 sm:$0xff]  }
 0x753   : > { %v1658_v16 = vpop.f32.mrb[22].mxu0  ;;  %2547 = vmatpush3.bf16.msra.mxu0 %v2693_v36  ;;  %v2694_v30 = vld [vmem:[%s3567_s9 + $0x38] ss:$12 sps:$4 sm:$0xff]  }
 0x754   : > { %v2497_v15 = vpop.f32.mrb[23].mxu0  ;;  %2548 = vmatprep.subr.bf16.mxu0 %v3626_v18  ;;  %v2695_v16 = vld [vmem:[%s3567_s9 + $0x50] ss:$12 sps:$4 sm:$0xff]  }
 0x755   : > { %v2696_v15 = vld [vmem:[%s3567_s9 + $0x68] ss:$12 sps:$4 sm:$0xff]  }
 0x757   : > { %2549 = vmatpush3.bf16.msra.mxu0 %v2694_v30 }
 0x758   : > { %2550 = vmatprep.subr.bf16.mxu0 %v3626_v18 }
 0x75b   : > { %2551 = vmatpush3.bf16.msra.mxu0 %v2695_v16 }
 0x75c   : > { %2552 = vmatprep.subr.bf16.mxu0 %v3626_v18 }
 0x75f   : > { %2553 = vmatpush3.bf16.msra.mxu0 %v2696_v15 }
 0x760   : > { %2554 = vmatprep.subr.bf16.mxu0 %v3626_v18 }
 0x771   : > { %v1695_v17 = vpop.f32.mrb[16].mxu1  ;;  %v1736_v0 = vpop.f32.mrb[24].mxu0 }
 0x772   : > { %v2571_v1 = vadd.f32 %v3328_v37, %v1695_v17  ;;  %v1697_v2 = vpop.f32.mrb[17].mxu1  ;;  %v2516_v3 = vpop.f32.mrb[25].mxu0  ;;  %v1737_v37 = vadd.f32 %v1736_v0, %v3334_v41  ;;  %v2697_v17 = vld [vmem:[%s3567_s9 + $0x80] ss:$12 sps:$4 sm:$0xff]   ;;  %v2698_v0 = vld [vmem:[%s3567_s9 + $0x98] ss:$12 sps:$4 sm:$0xff]  }
 0x773   : > { %v1699_v5 = vpop.f32.mrb[18].mxu1  ;;  %v1739_v7 = vpop.f32.mrb[26].mxu0  ;;  %v2573_v10 = vadd.f32 %v3330_v6, %v1697_v2  ;;  %2555 = vmatpush3.bf16.msra.mxu0 %v2697_v17  ;;  %v1913_v2 = vstv %s2189_s29 }
 0x774   : > { %v2254_v8 = vmul.f32 -1.442695, %v2571_v1  ;;  %v1700_v4 = vpop.f32.mrb[19].mxu1  ;;  %v2517_v9 = vpop.f32.mrb[27].mxu0  ;;  %2556 = vmatprep.subr.bf16.mxu0 %v3626_v18  ;;  %v2699_v1 = vld [vmem:[%s3567_s9 + $0xb0] ss:$12 sps:$4 sm:$0xff]  }
 0x775   : > { %v2255_v11 = vmul.f32 -1.442695, %v2573_v10 }
 0x776   : > { %2710 = vpow2.f32 %v2254_v8 }
 0x777   : > { %2712 = vpow2.f32 %v2255_v11  ;;  %2557 = vmatpush3.bf16.msra.mxu0 %v2698_v0 }
 0x778   : > { %2558 = vmatprep.subr.bf16.mxu0 %v3626_v18 }
 0x77b   : > { %2559 = vmatpush3.bf16.msra.mxu0 %v2699_v1 }
 0x780   : > { %v2711_v12 = vpop.eup %2710 }
 0x781   : > { %v1746_v13 = vadd.f32 1.0, %v2711_v12  ;;  %v2713_v20 = vpop.eup %2712  ;;  %v719_v12 = vld [vmem:[%s3568_s10 + $0x5] ss:$0 sm:$0xff] }
 0x782   : > { %v1753_v21 = vadd.f32 1.0, %v2713_v20 }
 0x783   : > { %2714 = vrcp.f32 %v1746_v13 }
 0x784   : > { %2716 = vrcp.f32 %v1753_v21 }
 0x78d   : > { %v2715_v22 = vpop.eup %2714 }
 0x78e   : > { %v1756_v24 = vmul.f32 %v2715_v22, %v1737_v37  ;;  %v2717_v6 = vpop.eup %2716 }
 0x78f   : > { %v1759_v26 = vsub.f32 1.0, %v2717_v6  ;;  %v1761_v38 = vmul.f32 %v2717_v6, %v3341_v31  ;;  %v2685_v31 = vld [vmem:[%s3567_s9 + $0x1c] ss:$12 sps:$4 sm:$0xff]  }
 0x790   : > { %v1757_v25 = vadd.f32 %v1756_v24, %v1656_v23 }
 0x792   : > { %2718 = vtanh.f32 %v1757_v25 }
 0x79c   : > { %v2719_v27 = vpop.eup %2718 }
 0x79d   : > { %v1760_v28 = vmul.f32 %v2719_v27, %v1759_v26 }
 0x79f   : > { %v1762_v40 = vadd.f32 %v1761_v38, %v1760_v28 }
 0x7a1   : > { %v1763_v41 = vpack.c.bf16 %v1762_v40, %v1762_v40  ;;  %2011 = vst [vmem:[%s554_s15] sm:$0xff] %v1762_v40 }
 0x7a3   : > { %v1768_v32 = vsel %vm728_vm1, %v1763_v41, 0 }
 0x7a4   : > { %2519 = vmatpush3.bf16.msra.mxu1 %v1768_v32 }
 0x7a5   : > { %2524 = vmatprep.subr.bf16.mxu1 %v3626_v18 }
 0x7a7   : > { %2521 = vmatmul.mubr.msk.bf16.vlgmr.msra.gmra.mrb[20].mxu1 %vm724_vm2, %v565_v44 }
 0x7a8   : > { %2525 = vmatpush3.bf16.msra.mxu1 %v2684_v46  ;;  %2540 = vmatprep.mubr.msk.bf16.mxu1 %vm2753_vm0, %v3626_v18 }
 0x7a9   : > { %2526 = vmatprep.subr.bf16.mxu1 %v3626_v18 }
 0x7ac   : > { %2527 = vmatpush3.bf16.msra.mxu1 %v2685_v31 }
 0x7ad   : > { %2528 = vmatprep.subr.bf16.mxu1 %v3626_v18 }
 0x7b0   : > { %2529 = vmatpush3.bf16.msra.mxu1 %v2686_v47 }
 0x7b1   : > { %2530 = vmatprep.subr.bf16.mxu1 %v3626_v18 }
 0x7b4   : > { %2531 = vmatpush3.bf16.msra.mxu1 %v2687_v48 }
 0x7b5   : > { %2532 = vmatprep.subr.bf16.mxu1 %v3626_v18 }
 0x7b8   : > { %2533 = vmatpush3.bf16.msra.mxu1 %v2688_v49 }
 0x7b9   : > { %2534 = vmatprep.subr.bf16.mxu1 %v3626_v18 }
 0x7bc   : > { %2535 = vmatpush3.bf16.msra.mxu1 %v2689_v50 }
 0x7bd   : > { %2536 = vmatprep.subr.bf16.mxu1 %v3626_v18 }
 0x7c0   : > { %2537 = vmatpush3.bf16.msra.mxu1 %v2690_v51 }
 0x7c1   : > { %2538 = vmatprep.subr.bf16.mxu1 %v3626_v18 }
 0x7c4   : > { %2539 = vmatpush3.bf16.msra.mxu1 %v2691_v52 }
 0x87a   : > { %v1804_v53 = vpop.f32.mrb[20].mxu1 }
 0x87b   : > { %v1810_v54 = vpack.c.bf16 %v1804_v53, %v1804_v53  ;;  %v2522_v55 = vpop.f32.mrb[21].mxu1 }
 0x87c   : > { %v1807_v56 = vpop.f32.mrb[22].mxu1 }
 0x87d   : > { %v1812_v57 = vshrl.u32 %v1810_v54, 16  ;;  %v2523_v58 = vpop.f32.mrb[23].mxu1 }
 0x87f   : > { %2541 = vmatmul.mubr.bf16.vlgmr.msra.gmra.mrb[24].mxu1 %v1812_v57 }
 0x952   : > { %v1897_v60 = vpop.f32.mrb[24].mxu1 }
 0x953   : > { %v1898_v61 = vadd.f32 %v1897_v60, %v717_v59  ;;  %v2542_v62 = vpop.f32.mrb[25].mxu1 }
 0x954   : > { %v1900_v43 = vpop.f32.mrb[26].mxu1 }
 0x955   : > { %v1904_v39 = vmin.f32 %v1898_v61, 0.0  ;;  %v2543_v45 = vpop.f32.mrb[27].mxu1  ;;  %v1903_v35 = vmax.f32 %v1898_v61, 0.0 }
 0x957   : > { %v1906_v33 = vmul.f32 %v1905_v42, %v1904_v39 }
 0x959   : > { %v1907_v14 = vadd.f32 %v1906_v33, %v1903_v35 }
 0x95b   : > { %v1908_v19 = vmul.f32 %v1907_v14, %v718_v34 }
 0x95d   : > { %v1910_v29 = vsel %vm1909_vm3, %v1908_v19, 0.0 }
 0x95e   : > { %1911 = vadd.xlane.f32.xlu0 %v1910_v29 }
 0x9eb   : > { %v1912_v3 = vpop.xlane.xlu0 %1911 }
 0x9ec   : > { %v1914_v5 = vadd.f32 %v1913_v2, %v1912_v3 }
 0x9ee   : > { %v2265_v7 = vmul.f32 -1.442695, %v1914_v5 }
 0x9f0   : > { %2720 = vpow2.f32 %v2265_v7 }
 0x9fa   : > { %v2721_v8 = vpop.eup %2720 }
 0x9fb   : > { %v1918_v4 = vadd.f32 1.0, %v2721_v8 }
 0x9fd   : > { %2722 = vrcp.f32 %v1918_v4 }
 0xa07   : > { %v2723_v9 = vpop.eup %2722 }
 0xa08   : > { %v1921_v10 = vmul.f32 %v2723_v9, %v1804_v53 }
 0xa0a   : > { %v1922_v11 = vpack.c.bf16 %v1921_v10, %v1921_v10 }
 0xa0c   : > { %2561 = vmatmul.mubr.bf16.vlgmr.msra.gmra.mrb[28].mxu0 %v1922_v11 }
 0xadf   : > { %v2005_v18 = vpop.f32.mrb[28].mxu0 }
 0xae0   : > { %v2006_v13 = vadd.f32 %v2005_v18, %v719_v12  ;;  %v2562_v20 = vpop.f32.mrb[29].mxu0 }
 0xae1   : > { %v2008_v21 = vpop.f32.mrb[30].mxu0 }
 0xae2   : > { %2012 = vst [vmem:[%s557_s16] sm:$0x1] %v2006_v13  ;;  %v2563_v37 = vpop.f32.mrb[31].mxu0 }
 0xae3 PF: > { %s25_s25 = sadd.s32 1, %s2749_s25  }
 0xae4   : > { %p22_p1 = scmp.ge.s32.totalorder %s25_s25, 5  }
 0xae6   :  { %24 = sbr.rel (!%p22_p1) target bundleno = 1 (0x1), region = 135 }
 0xaed   :  { %2044 = vsyncpa [#allocation3], 1 }
 0xaee   :  { %2046 = vsyncpa [#allocation3 + $0x1], 1 }

</bundles_post_ra>
